<compile_context>
chip_gen: v6e
topology: v6e:2x2x1
jax: 0.10.0
libtpu: 0.0.40
codegen_flags: <defaults>
</compile_context>

<pallas_src>
import functools

import jax
import jax.numpy as jnp
from jax import lax
from jax.experimental import pallas as pl
from jax.experimental.pallas import tpu as pltpu


# ----------------------------- config (synthetic) -----------------------------
def _find_multiple(n: int, k: int) -> int:
    if n % k == 0:
        return n
    return n + k - n % k


def _ffn_mult_to_intermediate_size(ffn_mult: float, n_embd: int) -> int:
    intermediate_size = int(2 * ffn_mult * n_embd / 3)
    return _find_multiple(intermediate_size, 256)


T = 8                                   # num tokens (flattened seq)
HIDDEN = 128                            # config.hidden_size
NUM_HEADS = 4                           # config.num_attention_heads
HEAD_DIM = HIDDEN // NUM_HEADS          # 32
N_HEADS_IN_GROUP = 2                    # block_config.attention.n_heads_in_group
NUM_KV_HEADS = NUM_HEADS // N_HEADS_IN_GROUP
Q_SIZE = NUM_HEADS * HEAD_DIM           # 128
KV_SIZE = NUM_KV_HEADS * HEAD_DIM       # 64
RMS_EPS = 1e-5
ROPE_THETA = 10000.0
FFN_MULT = 1.5
INTERMEDIATE = _ffn_mult_to_intermediate_size(FFN_MULT, HIDDEN)   # 256
SCALE = HEAD_DIM ** -0.5
NEG_INF = -1e30


# ------------------------- host-side constant tables --------------------------
def _rot_half_matrix(num_heads: int) -> jnp.ndarray:
    """Signed permutation matrix P so that (x @ P) == rotate_half(x) per head.

    For each head block:  P = [[0, I], [-I, 0]]  (HEAD_DIM x HEAD_DIM), i.e.
    (x @ P)[:, :d2] = -x[:, d2:]  and  (x @ P)[:, d2:] = x[:, :d2].
    """
    d2 = HEAD_DIM // 2
    eye = jnp.eye(d2, dtype=jnp.float32)
    zer = jnp.zeros((d2, d2), jnp.float32)
    blk = jnp.block([[zer, eye], [-eye, zer]])
    return jnp.kron(jnp.eye(num_heads, dtype=jnp.float32), blk)


_P_Q = _rot_half_matrix(NUM_HEADS)      # (Q_SIZE,  Q_SIZE)
_P_K = _rot_half_matrix(NUM_KV_HEADS)   # (KV_SIZE, KV_SIZE)


def _rope_tables_packed(positions):
    """cos/sin expanded to the packed head layout (lane-dense, full width)."""
    inv_freq = 1.0 / (ROPE_THETA ** (
        jnp.arange(0, HEAD_DIM, 2, dtype=jnp.float32) / HEAD_DIM))
    freqs = positions.astype(jnp.float32)[:, None] * inv_freq[None, :]   # (T, d2)
    cos = jnp.cos(freqs)
    sin = jnp.sin(freqs)
    cos_h = jnp.concatenate([cos, cos], axis=-1)                         # (T, D)
    sin_h = jnp.concatenate([sin, sin], axis=-1)
    cos_q = jnp.tile(cos_h, (1, NUM_HEADS))                              # (T, Q_SIZE)
    sin_q = jnp.tile(sin_h, (1, NUM_HEADS))
    cos_k = jnp.tile(cos_h, (1, NUM_KV_HEADS))                           # (T, KV_SIZE)
    sin_k = jnp.tile(sin_h, (1, NUM_KV_HEADS))
    return cos_q, sin_q, cos_k, sin_k


# --------------------------------- fused kernel --------------------------------
def _rmsnorm_f32(x, w):
    var = jnp.mean(x * x, axis=-1, keepdims=True)
    return x * lax.rsqrt(var + RMS_EPS) * w


def _make_layer_kernel(no_attn: bool, no_ffn: bool):
    """Build the fused decoder-layer kernel (flags are static)."""

    def kernel(hid_ref, res_ref, w_in_ref, w_q_ref, w_k_ref, w_v_ref,
               cos_q_ref, sin_q_ref, cos_k_ref, sin_k_ref, p_q_ref, p_k_ref,
               w_o_ref, w_post_ref, w_gate_ref, w_up_ref, w_down_ref,
               out_ref, res_out_ref):
        f32 = jnp.float32
        t = hid_ref.shape[0]

        hidden = hid_ref[...].astype(f32)
        residual = res_ref[...].astype(f32)

        if not no_attn:
            # ---- input_layernorm (fused residual add) ----
            x = hidden + residual
            residual = x
            h = _rmsnorm_f32(x, w_in_ref[...].astype(f32))

            # ---- QKV projections (packed head layout, lane-dense) ----
            q = jnp.dot(h, w_q_ref[...], preferred_element_type=f32)   # (T, 128)
            k = jnp.dot(h, w_k_ref[...], preferred_element_type=f32)   # (T, 64)
            v = jnp.dot(h, w_v_ref[...], preferred_element_type=f32)   # (T, 64)

            # ---- RoPE: rotate-half via signed permutation matmul ----
            q = (q * cos_q_ref[...]
                 + jnp.dot(q, p_q_ref[...], preferred_element_type=f32)
                 * sin_q_ref[...])
            k = (k * cos_k_ref[...]
                 + jnp.dot(k, p_k_ref[...], preferred_element_type=f32)
                 * sin_k_ref[...])

            # ---- causal GQA attention, all heads in-body, o-proj fused ----
            row = lax.broadcasted_iota(jnp.int32, (t, t), 0)
            col = lax.broadcasted_iota(jnp.int32, (t, t), 1)
            causal = col <= row

            w_o = w_o_ref[...]                                          # (128, 128)
            attn = jnp.zeros((t, HIDDEN), f32)
            for hq in range(NUM_HEADS):                 # static unrolled loop
                kv = hq // N_HEADS_IN_GROUP
                q_h = q[:, hq * HEAD_DIM:(hq + 1) * HEAD_DIM]
                k_h = k[:, kv * HEAD_DIM:(kv + 1) * HEAD_DIM]
                v_h = v[:, kv * HEAD_DIM:(kv + 1) * HEAD_DIM]

                s = lax.dot_general(q_h, k_h, (((1,), (1,)), ((), ())),
                                    preferred_element_type=f32) * SCALE
                s = jnp.where(causal, s, NEG_INF)
                p = jnp.exp(s - jnp.max(s, axis=-1, keepdims=True))
                p = p * pl.reciprocal(jnp.sum(p, axis=-1, keepdims=True),
                                      approx=True)
                o_h = jnp.dot(p, v_h, preferred_element_type=f32)       # (T, 32)
                # fused o-projection: lane-dense (T, HIDDEN) partial sums
                attn = attn + jnp.dot(
                    o_h, w_o[hq * HEAD_DIM:(hq + 1) * HEAD_DIM, :],
                    preferred_element_type=f32)
            hidden = attn

        if not no_ffn:
            # ---- post_attention_layernorm (fused residual add) ----
            x = hidden + residual
            residual = x
            h = _rmsnorm_f32(x, w_post_ref[...].astype(f32))

            # ---- LlamaMLP: gate/up matmuls + SiLU + down ----
            g = jnp.dot(h, w_gate_ref[...], preferred_element_type=f32)
            u = jnp.dot(h, w_up_ref[...], preferred_element_type=f32)
            act = g * jax.nn.sigmoid(g) * u
            hidden = jnp.dot(act, w_down_ref[...], preferred_element_type=f32)

        out_ref[...] = hidden.astype(out_ref.dtype)
        res_out_ref[...] = residual.astype(res_out_ref.dtype)

    return kernel


# ---------------------------------- wrapper ------------------------------------
def _full_spec(shape):
    n = len(shape)
    return pl.BlockSpec(shape, lambda i, _n=n: (0,) * _n)


@functools.partial(jax.jit,
                   static_argnames=("is_no_op_attention", "is_no_op_ffn"))
def decilm_decoder_layer(positions, hidden_states, residual, params,
                         is_no_op_attention=False, is_no_op_ffn=False):
    """Mirrors DeciLMDecoderLayer.forward (single fused Pallas call)."""
    if is_no_op_attention and is_no_op_ffn:
        return hidden_states, residual

    M, H = hidden_states.shape
    dtype = hidden_states.dtype
    if residual is None:
        # residual=None: the module sets residual = hidden_states before the
        # norm; feeding zeros gives hidden + residual == hidden_states.
        residual = jnp.zeros_like(hidden_states)

    cos_q, sin_q, cos_k, sin_k = _rope_tables_packed(positions)

    inputs = (hidden_states, residual,
              params["w_in_ln"], params["w_q"], params["w_k"], params["w_v"],
              cos_q, sin_q, cos_k, sin_k, _P_Q, _P_K,
              params["w_o"], params["w_post_ln"],
              params["w_gate"], params["w_up"], params["w_down"])

    out = pl.pallas_call(
        _make_layer_kernel(is_no_op_attention, is_no_op_ffn),
        out_shape=(jax.ShapeDtypeStruct((M, H), dtype),
                   jax.ShapeDtypeStruct((M, H), dtype)),
        grid=(1,),
        in_specs=[_full_spec(a.shape) for a in inputs],
        out_specs=(_full_spec((M, H)), _full_spec((M, H))),
        input_output_aliases={1: 1},     # reuse residual buffer for new residual
        compiler_params=pltpu.CompilerParams(
            dimension_semantics=("arbitrary",)),
    )(*inputs)
    return out


# --------------------------- pure-JAX reference --------------------------------
def ref_forward(positions, hidden_states, residual, params):
    def _norm(x, w, res=None):
        if res is not None:
            x = x + res
        res_out = x
        var = jnp.mean(x * x, axis=-1, keepdims=True)
        return x * lax.rsqrt(var + RMS_EPS) * w[0], res_out

    t = hidden_states.shape[0]
    h, residual = _norm(hidden_states, params["w_in_ln"], residual)
    q = (h @ params["w_q"]).reshape(t, NUM_HEADS, HEAD_DIM)
    k = (h @ params["w_k"]).reshape(t, NUM_KV_HEADS, HEAD_DIM)
    v = (h @ params["w_v"]).reshape(t, NUM_KV_HEADS, HEAD_DIM)

    inv_freq = 1.0 / (ROPE_THETA ** (
        jnp.arange(0, HEAD_DIM, 2, dtype=jnp.float32) / HEAD_DIM))
    freqs = positions.astype(jnp.float32)[:, None] * inv_freq[None, :]
    cos, sin = jnp.cos(freqs), jnp.sin(freqs)
    d2 = HEAD_DIM // 2

    def rope(x):
        x1, x2 = x[..., :d2], x[..., d2:]
        c, s = cos[:, None, :], sin[:, None, :]
        return jnp.concatenate([x1 * c - x2 * s, x2 * c + x1 * s], axis=-1)

    q, k = rope(q), rope(k)
    k = jnp.repeat(k, N_HEADS_IN_GROUP, axis=1)
    v = jnp.repeat(v, N_HEADS_IN_GROUP, axis=1)
    s = jnp.einsum("tnd,snd->nts", q, k) * SCALE
    mask = jnp.tril(jnp.ones((t, t), bool))
    s = jnp.where(mask[None], s, NEG_INF)
    p = jax.nn.softmax(s, axis=-1)
    o = jnp.einsum("nts,snd->tnd", p, v).reshape(t, HIDDEN)
    h = o @ params["w_o"]
    h, residual = _norm(h, params["w_post_ln"], residual)
    g = h @ params["w_gate"]
    u = h @ params["w_up"]
    h = (g * jax.nn.sigmoid(g) * u) @ params["w_down"]
    return h, residual


# ----------------------------------- main ---------------------------------------
if __name__ == "__main__":
    key = jax.random.PRNGKey(0)
    k_q, k_k, k_v, k_o, k_g, k_u, k_d, k_x = jax.random.split(key, 8)

    params = {
        # RMSNorm weights initialized to ones (as in the PyTorch module).
        "w_in_ln": jnp.ones((1, HIDDEN), jnp.float32),
        "w_post_ln": jnp.ones((1, HIDDEN), jnp.float32),
        "w_q": 0.02 * jax.random.normal(k_q, (HIDDEN, Q_SIZE), jnp.float32),
        "w_k": 0.02 * jax.random.normal(k_k, (HIDDEN, KV_SIZE), jnp.float32),
        "w_v": 0.02 * jax.random.normal(k_v, (HIDDEN, KV_SIZE), jnp.float32),
        "w_o": 0.02 * jax.random.normal(k_o, (Q_SIZE, HIDDEN), jnp.float32),
        "w_gate": 0.02 * jax.random.normal(k_g, (HIDDEN, INTERMEDIATE),
                                           jnp.float32),
        "w_up": 0.02 * jax.random.normal(k_u, (HIDDEN, INTERMEDIATE),
                                         jnp.float32),
        "w_down": 0.02 * jax.random.normal(k_d, (INTERMEDIATE, HIDDEN),
                                           jnp.float32),
    }

    positions = jnp.arange(T, dtype=jnp.int32)
    hidden_states = jax.random.normal(k_x, (T, HIDDEN), jnp.float32)

    # layer 0: residual starts as None (module sets it)
    out1, res1 = decilm_decoder_layer(positions, hidden_states, None, params)
    # layer 1: residual is carried (non-None path)
    out2, res2 = decilm_decoder_layer(positions, out1, res1, params)
    out1, res1, out2, res2 = jax.block_until_ready((out1, res1, out2, res2))

    ref_out1, ref_res1 = ref_forward(positions, hidden_states, None, params)
    ref_out2, ref_res2 = ref_forward(positions, ref_out1, ref_res1, params)

    assert out1.shape == (T, HIDDEN) and res1.shape == (T, HIDDEN)
    assert jnp.allclose(out1, ref_out1, rtol=1e-3, atol=1e-3)
    assert jnp.allclose(res1, ref_res1, rtol=1e-3, atol=1e-3)
    assert jnp.allclose(out2, ref_out2, rtol=2e-3, atol=2e-3)
    assert jnp.allclose(res2, ref_res2, rtol=2e-3, atol=2e-3)

    print("KERNEL_OK")
</pallas_src>

<mosaic_0001>
module attributes {stable_mosaic.version = 11 : i64} {
  func.func @kernel(%arg0: i32, %arg1: memref<8x128xf32, #tpu.memory_space<vmem>>, %arg2: memref<8x128xf32, #tpu.memory_space<vmem>>, %arg3: memref<1x128xf32, #tpu.memory_space<vmem>>, %arg4: memref<128x128xf32, #tpu.memory_space<vmem>>, %arg5: memref<128x64xf32, #tpu.memory_space<vmem>>, %arg6: memref<128x64xf32, #tpu.memory_space<vmem>>, %arg7: memref<8x128xf32, #tpu.memory_space<vmem>>, %arg8: memref<8x128xf32, #tpu.memory_space<vmem>>, %arg9: memref<8x64xf32, #tpu.memory_space<vmem>>, %arg10: memref<8x64xf32, #tpu.memory_space<vmem>>, %arg11: memref<128x128xf32, #tpu.memory_space<vmem>>, %arg12: memref<64x64xf32, #tpu.memory_space<vmem>>, %arg13: memref<128x128xf32, #tpu.memory_space<vmem>>, %arg14: memref<1x128xf32, #tpu.memory_space<vmem>>, %arg15: memref<128x256xf32, #tpu.memory_space<vmem>>, %arg16: memref<128x256xf32, #tpu.memory_space<vmem>>, %arg17: memref<256x128xf32, #tpu.memory_space<vmem>>, %arg18: memref<8x128xf32, #tpu.memory_space<vmem>>, %arg19: memref<8x128xf32, #tpu.memory_space<vmem>>) attributes {dimension_semantics = [#tpu.dimension_semantics<arbitrary>], iteration_bounds = array<i64: 1>, scalar_prefetch = 0 : i64, scratch_operands = 0 : i64, tpu.core_type = #tpu.core_type<tc>, window_params = [{pipeline_mode = #tpu.pipeline_mode<synchronous>, transform_indices = @transform_0, window_bounds = array<i64: 8, 128>}, {pipeline_mode = #tpu.pipeline_mode<synchronous>, transform_indices = @transform_1, window_bounds = array<i64: 8, 128>}, {pipeline_mode = #tpu.pipeline_mode<synchronous>, transform_indices = @transform_2, window_bounds = array<i64: 1, 128>}, {pipeline_mode = #tpu.pipeline_mode<synchronous>, transform_indices = @transform_3, window_bounds = array<i64: 128, 128>}, {pipeline_mode = #tpu.pipeline_mode<synchronous>, transform_indices = @transform_4, window_bounds = array<i64: 128, 64>}, {pipeline_mode = #tpu.pipeline_mode<synchronous>, transform_indices = @transform_5, window_bounds = array<i64: 128, 64>}, {pipeline_mode = #tpu.pipeline_mode<synchronous>, transform_indices = @transform_6, window_bounds = array<i64: 8, 128>}, {pipeline_mode = #tpu.pipeline_mode<synchronous>, transform_indices = @transform_7, window_bounds = array<i64: 8, 128>}, {pipeline_mode = #tpu.pipeline_mode<synchronous>, transform_indices = @transform_8, window_bounds = array<i64: 8, 64>}, {pipeline_mode = #tpu.pipeline_mode<synchronous>, transform_indices = @transform_9, window_bounds = array<i64: 8, 64>}, {pipeline_mode = #tpu.pipeline_mode<synchronous>, transform_indices = @transform_10, window_bounds = array<i64: 128, 128>}, {pipeline_mode = #tpu.pipeline_mode<synchronous>, transform_indices = @transform_11, window_bounds = array<i64: 64, 64>}, {pipeline_mode = #tpu.pipeline_mode<synchronous>, transform_indices = @transform_12, window_bounds = array<i64: 128, 128>}, {pipeline_mode = #tpu.pipeline_mode<synchronous>, transform_indices = @transform_13, window_bounds = array<i64: 1, 128>}, {pipeline_mode = #tpu.pipeline_mode<synchronous>, transform_indices = @transform_14, window_bounds = array<i64: 128, 256>}, {pipeline_mode = #tpu.pipeline_mode<synchronous>, transform_indices = @transform_15, window_bounds = array<i64: 128, 256>}, {pipeline_mode = #tpu.pipeline_mode<synchronous>, transform_indices = @transform_16, window_bounds = array<i64: 256, 128>}, {pipeline_mode = #tpu.pipeline_mode<synchronous>, transform_indices = @transform_17, window_bounds = array<i64: 8, 128>}, {pipeline_mode = #tpu.pipeline_mode<synchronous>, transform_indices = @transform_18, window_bounds = array<i64: 8, 128>}]} {
    %c0 = arith.constant 0 : index
    %c0_0 = arith.constant 0 : index
    %0 = vector.load %arg1[%c0, %c0_0] : memref<8x128xf32, #tpu.memory_space<vmem>>, vector<8x128xf32>
    %c0_1 = arith.constant 0 : index
    %c0_2 = arith.constant 0 : index
    %1 = vector.load %arg2[%c0_1, %c0_2] : memref<8x128xf32, #tpu.memory_space<vmem>>, vector<8x128xf32>
    %2 = arith.addf %0, %1 : vector<8x128xf32>
    %c0_3 = arith.constant 0 : index
    %c0_4 = arith.constant 0 : index
    %3 = vector.load %arg3[%c0_3, %c0_4] : memref<1x128xf32, #tpu.memory_space<vmem>>, vector<1x128xf32>
    %4 = arith.mulf %2, %2 : vector<8x128xf32>
    %cst = arith.constant dense<0.000000e+00> : vector<8xf32>
    %5 = vector.multi_reduction <add>, %4, %cst [1] : vector<8x128xf32> to vector<8xf32>
    %6 = vector.shape_cast %5 : vector<8xf32> to vector<8x1xf32>
    %cst_5 = arith.constant 1.280000e+02 : f32
    %7 = vector.broadcast %cst_5 : f32 to vector<8x1xf32>
    %8 = arith.divf %6, %7 : vector<8x1xf32>
    %cst_6 = arith.constant 9.99999974E-6 : f32
    %9 = vector.broadcast %cst_6 : f32 to vector<8x1xf32>
    %10 = arith.addf %8, %9 : vector<8x1xf32>
    %11 = math.rsqrt %10 : vector<8x1xf32>
    %12 = vector.broadcast %11 : vector<8x1xf32> to vector<8x128xf32>
    %13 = arith.mulf %2, %12 : vector<8x128xf32>
    %14 = vector.broadcast %3 : vector<1x128xf32> to vector<8x128xf32>
    %15 = arith.mulf %13, %14 : vector<8x128xf32>
    %c0_7 = arith.constant 0 : index
    %c0_8 = arith.constant 0 : index
    %16 = vector.load %arg4[%c0_7, %c0_8] : memref<128x128xf32, #tpu.memory_space<vmem>>, vector<128x128xf32>
    %cst_9 = arith.constant dense<0.000000e+00> : vector<8x128xf32>
    %17 = tpu.matmul %15, %16, %cst_9 {dimension_numbers = #tpu.dot_dimension_numbers<[1], [0], [0], [1], [0, 0, 1, 1], [], []>} : vector<8x128xf32>, vector<128x128xf32>, vector<8x128xf32> -> vector<8x128xf32>
    %c0_10 = arith.constant 0 : index
    %c0_11 = arith.constant 0 : index
    %18 = vector.load %arg5[%c0_10, %c0_11] : memref<128x64xf32, #tpu.memory_space<vmem>>, vector<128x64xf32>
    %cst_12 = arith.constant dense<0.000000e+00> : vector<8x64xf32>
    %19 = tpu.matmul %15, %18, %cst_12 {dimension_numbers = #tpu.dot_dimension_numbers<[1], [0], [0], [1], [0, 0, 1, 1], [], []>} : vector<8x128xf32>, vector<128x64xf32>, vector<8x64xf32> -> vector<8x64xf32>
    %c0_13 = arith.constant 0 : index
    %c0_14 = arith.constant 0 : index
    %20 = vector.load %arg6[%c0_13, %c0_14] : memref<128x64xf32, #tpu.memory_space<vmem>>, vector<128x64xf32>
    %cst_15 = arith.constant dense<0.000000e+00> : vector<8x64xf32>
    %21 = tpu.matmul %15, %20, %cst_15 {dimension_numbers = #tpu.dot_dimension_numbers<[1], [0], [0], [1], [0, 0, 1, 1], [], []>} : vector<8x128xf32>, vector<128x64xf32>, vector<8x64xf32> -> vector<8x64xf32>
    %c0_16 = arith.constant 0 : index
    %c0_17 = arith.constant 0 : index
    %22 = vector.load %arg7[%c0_16, %c0_17] : memref<8x128xf32, #tpu.memory_space<vmem>>, vector<8x128xf32>
    %23 = arith.mulf %17, %22 : vector<8x128xf32>
    %c0_18 = arith.constant 0 : index
    %c0_19 = arith.constant 0 : index
    %24 = vector.load %arg11[%c0_18, %c0_19] : memref<128x128xf32, #tpu.memory_space<vmem>>, vector<128x128xf32>
    %cst_20 = arith.constant dense<0.000000e+00> : vector<8x128xf32>
    %25 = tpu.matmul %17, %24, %cst_20 {dimension_numbers = #tpu.dot_dimension_numbers<[1], [0], [0], [1], [0, 0, 1, 1], [], []>} : vector<8x128xf32>, vector<128x128xf32>, vector<8x128xf32> -> vector<8x128xf32>
    %c0_21 = arith.constant 0 : index
    %c0_22 = arith.constant 0 : index
    %26 = vector.load %arg8[%c0_21, %c0_22] : memref<8x128xf32, #tpu.memory_space<vmem>>, vector<8x128xf32>
    %27 = arith.mulf %25, %26 : vector<8x128xf32>
    %28 = arith.addf %23, %27 : vector<8x128xf32>
    %c0_23 = arith.constant 0 : index
    %c0_24 = arith.constant 0 : index
    %29 = vector.load %arg9[%c0_23, %c0_24] : memref<8x64xf32, #tpu.memory_space<vmem>>, vector<8x64xf32>
    %30 = arith.mulf %19, %29 : vector<8x64xf32>
    %c0_25 = arith.constant 0 : index
    %c0_26 = arith.constant 0 : index
    %31 = vector.load %arg12[%c0_25, %c0_26] : memref<64x64xf32, #tpu.memory_space<vmem>>, vector<64x64xf32>
    %cst_27 = arith.constant dense<0.000000e+00> : vector<8x64xf32>
    %32 = tpu.matmul %19, %31, %cst_27 {dimension_numbers = #tpu.dot_dimension_numbers<[1], [0], [0], [1], [0, 0, 1, 1], [], []>} : vector<8x64xf32>, vector<64x64xf32>, vector<8x64xf32> -> vector<8x64xf32>
    %c0_28 = arith.constant 0 : index
    %c0_29 = arith.constant 0 : index
    %33 = vector.load %arg10[%c0_28, %c0_29] : memref<8x64xf32, #tpu.memory_space<vmem>>, vector<8x64xf32>
    %34 = arith.mulf %32, %33 : vector<8x64xf32>
    %35 = arith.addf %30, %34 : vector<8x64xf32>
    %36 = tpu.iota {dimensions = array<i32: 0>} : vector<8x8xi32>
    %37 = tpu.iota {dimensions = array<i32: 1>} : vector<8x8xi32>
    %38 = arith.cmpi sle, %37, %36 : vector<8x8xi32>
    %c0_30 = arith.constant 0 : index
    %c0_31 = arith.constant 0 : index
    %39 = vector.load %arg13[%c0_30, %c0_31] : memref<128x128xf32, #tpu.memory_space<vmem>>, vector<128x128xf32>
    %cst_32 = arith.constant 0.000000e+00 : f32
    %40 = vector.broadcast %cst_32 : f32 to vector<8x128xf32>
    %41 = vector.extract_strided_slice %28 {offsets = [0, 0], sizes = [8, 32], strides = [1, 1]} : vector<8x128xf32> to vector<8x32xf32>
    %42 = vector.extract_strided_slice %35 {offsets = [0, 0], sizes = [8, 32], strides = [1, 1]} : vector<8x64xf32> to vector<8x32xf32>
    %43 = vector.extract_strided_slice %21 {offsets = [0, 0], sizes = [8, 32], strides = [1, 1]} : vector<8x64xf32> to vector<8x32xf32>
    %cst_33 = arith.constant dense<0.000000e+00> : vector<8x8xf32>
    %44 = tpu.matmul %41, %42, %cst_33 {dimension_numbers = #tpu.dot_dimension_numbers<[1], [1], [0], [0], [0, 0, 1, 0], [], []>} : vector<8x32xf32>, vector<8x32xf32>, vector<8x8xf32> -> vector<8x8xf32>
    %cst_34 = arith.constant 0.176776692 : f32
    %45 = vector.broadcast %cst_34 : f32 to vector<8x8xf32>
    %46 = arith.mulf %44, %45 : vector<8x8xf32>
    %cst_35 = arith.constant -1.000000e+30 : f32
    %47 = vector.broadcast %cst_35 : f32 to vector<8x8xf32>
    %48 = arith.select %38, %46, %47 : vector<8x8xi1>, vector<8x8xf32>
    %cst_36 = arith.constant dense<0xFF800000> : vector<8xf32>
    %49 = vector.multi_reduction <maximumf>, %48, %cst_36 [1] : vector<8x8xf32> to vector<8xf32>
    %50 = vector.shape_cast %49 : vector<8xf32> to vector<8x1xf32>
    %51 = vector.broadcast %50 : vector<8x1xf32> to vector<8x8xf32>
    %52 = arith.subf %48, %51 : vector<8x8xf32>
    %53 = math.exp %52 : vector<8x8xf32>
    %cst_37 = arith.constant dense<0.000000e+00> : vector<8xf32>
    %54 = vector.multi_reduction <add>, %53, %cst_37 [1] : vector<8x8xf32> to vector<8xf32>
    %55 = vector.shape_cast %54 : vector<8xf32> to vector<8x1xf32>
    %56 = tpu.reciprocal %55 {approx = true} : vector<8x1xf32> -> vector<8x1xf32>
    %57 = vector.broadcast %56 : vector<8x1xf32> to vector<8x8xf32>
    %58 = arith.mulf %53, %57 : vector<8x8xf32>
    %cst_38 = arith.constant dense<0.000000e+00> : vector<8x32xf32>
    %59 = tpu.matmul %58, %43, %cst_38 {dimension_numbers = #tpu.dot_dimension_numbers<[1], [0], [0], [1], [0, 0, 1, 1], [], []>} : vector<8x8xf32>, vector<8x32xf32>, vector<8x32xf32> -> vector<8x32xf32>
    %60 = vector.extract_strided_slice %39 {offsets = [0, 0], sizes = [32, 128], strides = [1, 1]} : vector<128x128xf32> to vector<32x128xf32>
    %cst_39 = arith.constant dense<0.000000e+00> : vector<8x128xf32>
    %61 = tpu.matmul %59, %60, %cst_39 {dimension_numbers = #tpu.dot_dimension_numbers<[1], [0], [0], [1], [0, 0, 1, 1], [], []>} : vector<8x32xf32>, vector<32x128xf32>, vector<8x128xf32> -> vector<8x128xf32>
    %62 = arith.addf %40, %61 : vector<8x128xf32>
    %63 = vector.extract_strided_slice %28 {offsets = [0, 32], sizes = [8, 32], strides = [1, 1]} : vector<8x128xf32> to vector<8x32xf32>
    %64 = vector.extract_strided_slice %35 {offsets = [0, 0], sizes = [8, 32], strides = [1, 1]} : vector<8x64xf32> to vector<8x32xf32>
    %65 = vector.extract_strided_slice %21 {offsets = [0, 0], sizes = [8, 32], strides = [1, 1]} : vector<8x64xf32> to vector<8x32xf32>
    %cst_40 = arith.constant dense<0.000000e+00> : vector<8x8xf32>
    %66 = tpu.matmul %63, %64, %cst_40 {dimension_numbers = #tpu.dot_dimension_numbers<[1], [1], [0], [0], [0, 0, 1, 0], [], []>} : vector<8x32xf32>, vector<8x32xf32>, vector<8x8xf32> -> vector<8x8xf32>
    %cst_41 = arith.constant 0.176776692 : f32
    %67 = vector.broadcast %cst_41 : f32 to vector<8x8xf32>
    %68 = arith.mulf %66, %67 : vector<8x8xf32>
    %cst_42 = arith.constant -1.000000e+30 : f32
    %69 = vector.broadcast %cst_42 : f32 to vector<8x8xf32>
    %70 = arith.select %38, %68, %69 : vector<8x8xi1>, vector<8x8xf32>
    %cst_43 = arith.constant dense<0xFF800000> : vector<8xf32>
    %71 = vector.multi_reduction <maximumf>, %70, %cst_43 [1] : vector<8x8xf32> to vector<8xf32>
    %72 = vector.shape_cast %71 : vector<8xf32> to vector<8x1xf32>
    %73 = vector.broadcast %72 : vector<8x1xf32> to vector<8x8xf32>
    %74 = arith.subf %70, %73 : vector<8x8xf32>
    %75 = math.exp %74 : vector<8x8xf32>
    %cst_44 = arith.constant dense<0.000000e+00> : vector<8xf32>
    %76 = vector.multi_reduction <add>, %75, %cst_44 [1] : vector<8x8xf32> to vector<8xf32>
    %77 = vector.shape_cast %76 : vector<8xf32> to vector<8x1xf32>
    %78 = tpu.reciprocal %77 {approx = true} : vector<8x1xf32> -> vector<8x1xf32>
    %79 = vector.broadcast %78 : vector<8x1xf32> to vector<8x8xf32>
    %80 = arith.mulf %75, %79 : vector<8x8xf32>
    %cst_45 = arith.constant dense<0.000000e+00> : vector<8x32xf32>
    %81 = tpu.matmul %80, %65, %cst_45 {dimension_numbers = #tpu.dot_dimension_numbers<[1], [0], [0], [1], [0, 0, 1, 1], [], []>} : vector<8x8xf32>, vector<8x32xf32>, vector<8x32xf32> -> vector<8x32xf32>
    %82 = vector.extract_strided_slice %39 {offsets = [32, 0], sizes = [32, 128], strides = [1, 1]} : vector<128x128xf32> to vector<32x128xf32>
    %cst_46 = arith.constant dense<0.000000e+00> : vector<8x128xf32>
    %83 = tpu.matmul %81, %82, %cst_46 {dimension_numbers = #tpu.dot_dimension_numbers<[1], [0], [0], [1], [0, 0, 1, 1], [], []>} : vector<8x32xf32>, vector<32x128xf32>, vector<8x128xf32> -> vector<8x128xf32>
    %84 = arith.addf %62, %83 : vector<8x128xf32>
    %85 = vector.extract_strided_slice %28 {offsets = [0, 64], sizes = [8, 32], strides = [1, 1]} : vector<8x128xf32> to vector<8x32xf32>
    %86 = vector.extract_strided_slice %35 {offsets = [0, 32], sizes = [8, 32], strides = [1, 1]} : vector<8x64xf32> to vector<8x32xf32>
    %87 = vector.extract_strided_slice %21 {offsets = [0, 32], sizes = [8, 32], strides = [1, 1]} : vector<8x64xf32> to vector<8x32xf32>
    %cst_47 = arith.constant dense<0.000000e+00> : vector<8x8xf32>
    %88 = tpu.matmul %85, %86, %cst_47 {dimension_numbers = #tpu.dot_dimension_numbers<[1], [1], [0], [0], [0, 0, 1, 0], [], []>} : vector<8x32xf32>, vector<8x32xf32>, vector<8x8xf32> -> vector<8x8xf32>
    %cst_48 = arith.constant 0.176776692 : f32
    %89 = vector.broadcast %cst_48 : f32 to vector<8x8xf32>
    %90 = arith.mulf %88, %89 : vector<8x8xf32>
    %cst_49 = arith.constant -1.000000e+30 : f32
    %91 = vector.broadcast %cst_49 : f32 to vector<8x8xf32>
    %92 = arith.select %38, %90, %91 : vector<8x8xi1>, vector<8x8xf32>
    %cst_50 = arith.constant dense<0xFF800000> : vector<8xf32>
    %93 = vector.multi_reduction <maximumf>, %92, %cst_50 [1] : vector<8x8xf32> to vector<8xf32>
    %94 = vector.shape_cast %93 : vector<8xf32> to vector<8x1xf32>
    %95 = vector.broadcast %94 : vector<8x1xf32> to vector<8x8xf32>
    %96 = arith.subf %92, %95 : vector<8x8xf32>
    %97 = math.exp %96 : vector<8x8xf32>
    %cst_51 = arith.constant dense<0.000000e+00> : vector<8xf32>
    %98 = vector.multi_reduction <add>, %97, %cst_51 [1] : vector<8x8xf32> to vector<8xf32>
    %99 = vector.shape_cast %98 : vector<8xf32> to vector<8x1xf32>
    %100 = tpu.reciprocal %99 {approx = true} : vector<8x1xf32> -> vector<8x1xf32>
    %101 = vector.broadcast %100 : vector<8x1xf32> to vector<8x8xf32>
    %102 = arith.mulf %97, %101 : vector<8x8xf32>
    %cst_52 = arith.constant dense<0.000000e+00> : vector<8x32xf32>
    %103 = tpu.matmul %102, %87, %cst_52 {dimension_numbers = #tpu.dot_dimension_numbers<[1], [0], [0], [1], [0, 0, 1, 1], [], []>} : vector<8x8xf32>, vector<8x32xf32>, vector<8x32xf32> -> vector<8x32xf32>
    %104 = vector.extract_strided_slice %39 {offsets = [64, 0], sizes = [32, 128], strides = [1, 1]} : vector<128x128xf32> to vector<32x128xf32>
    %cst_53 = arith.constant dense<0.000000e+00> : vector<8x128xf32>
    %105 = tpu.matmul %103, %104, %cst_53 {dimension_numbers = #tpu.dot_dimension_numbers<[1], [0], [0], [1], [0, 0, 1, 1], [], []>} : vector<8x32xf32>, vector<32x128xf32>, vector<8x128xf32> -> vector<8x128xf32>
    %106 = arith.addf %84, %105 : vector<8x128xf32>
    %107 = vector.extract_strided_slice %28 {offsets = [0, 96], sizes = [8, 32], strides = [1, 1]} : vector<8x128xf32> to vector<8x32xf32>
    %108 = vector.extract_strided_slice %35 {offsets = [0, 32], sizes = [8, 32], strides = [1, 1]} : vector<8x64xf32> to vector<8x32xf32>
    %109 = vector.extract_strided_slice %21 {offsets = [0, 32], sizes = [8, 32], strides = [1, 1]} : vector<8x64xf32> to vector<8x32xf32>
    %cst_54 = arith.constant dense<0.000000e+00> : vector<8x8xf32>
    %110 = tpu.matmul %107, %108, %cst_54 {dimension_numbers = #tpu.dot_dimension_numbers<[1], [1], [0], [0], [0, 0, 1, 0], [], []>} : vector<8x32xf32>, vector<8x32xf32>, vector<8x8xf32> -> vector<8x8xf32>
    %cst_55 = arith.constant 0.176776692 : f32
    %111 = vector.broadcast %cst_55 : f32 to vector<8x8xf32>
    %112 = arith.mulf %110, %111 : vector<8x8xf32>
    %cst_56 = arith.constant -1.000000e+30 : f32
    %113 = vector.broadcast %cst_56 : f32 to vector<8x8xf32>
    %114 = arith.select %38, %112, %113 : vector<8x8xi1>, vector<8x8xf32>
    %cst_57 = arith.constant dense<0xFF800000> : vector<8xf32>
    %115 = vector.multi_reduction <maximumf>, %114, %cst_57 [1] : vector<8x8xf32> to vector<8xf32>
    %116 = vector.shape_cast %115 : vector<8xf32> to vector<8x1xf32>
    %117 = vector.broadcast %116 : vector<8x1xf32> to vector<8x8xf32>
    %118 = arith.subf %114, %117 : vector<8x8xf32>
    %119 = math.exp %118 : vector<8x8xf32>
    %cst_58 = arith.constant dense<0.000000e+00> : vector<8xf32>
    %120 = vector.multi_reduction <add>, %119, %cst_58 [1] : vector<8x8xf32> to vector<8xf32>
    %121 = vector.shape_cast %120 : vector<8xf32> to vector<8x1xf32>
    %122 = tpu.reciprocal %121 {approx = true} : vector<8x1xf32> -> vector<8x1xf32>
    %123 = vector.broadcast %122 : vector<8x1xf32> to vector<8x8xf32>
    %124 = arith.mulf %119, %123 : vector<8x8xf32>
    %cst_59 = arith.constant dense<0.000000e+00> : vector<8x32xf32>
    %125 = tpu.matmul %124, %109, %cst_59 {dimension_numbers = #tpu.dot_dimension_numbers<[1], [0], [0], [1], [0, 0, 1, 1], [], []>} : vector<8x8xf32>, vector<8x32xf32>, vector<8x32xf32> -> vector<8x32xf32>
    %126 = vector.extract_strided_slice %39 {offsets = [96, 0], sizes = [32, 128], strides = [1, 1]} : vector<128x128xf32> to vector<32x128xf32>
    %cst_60 = arith.constant dense<0.000000e+00> : vector<8x128xf32>
    %127 = tpu.matmul %125, %126, %cst_60 {dimension_numbers = #tpu.dot_dimension_numbers<[1], [0], [0], [1], [0, 0, 1, 1], [], []>} : vector<8x32xf32>, vector<32x128xf32>, vector<8x128xf32> -> vector<8x128xf32>
    %128 = arith.addf %106, %127 : vector<8x128xf32>
    %129 = arith.addf %128, %2 : vector<8x128xf32>
    %c0_61 = arith.constant 0 : index
    %c0_62 = arith.constant 0 : index
    %130 = vector.load %arg14[%c0_61, %c0_62] : memref<1x128xf32, #tpu.memory_space<vmem>>, vector<1x128xf32>
    %131 = arith.mulf %129, %129 : vector<8x128xf32>
    %cst_63 = arith.constant dense<0.000000e+00> : vector<8xf32>
    %132 = vector.multi_reduction <add>, %131, %cst_63 [1] : vector<8x128xf32> to vector<8xf32>
    %133 = vector.shape_cast %132 : vector<8xf32> to vector<8x1xf32>
    %cst_64 = arith.constant 1.280000e+02 : f32
    %134 = vector.broadcast %cst_64 : f32 to vector<8x1xf32>
    %135 = arith.divf %133, %134 : vector<8x1xf32>
    %cst_65 = arith.constant 9.99999974E-6 : f32
    %136 = vector.broadcast %cst_65 : f32 to vector<8x1xf32>
    %137 = arith.addf %135, %136 : vector<8x1xf32>
    %138 = math.rsqrt %137 : vector<8x1xf32>
    %139 = vector.broadcast %138 : vector<8x1xf32> to vector<8x128xf32>
    %140 = arith.mulf %129, %139 : vector<8x128xf32>
    %141 = vector.broadcast %130 : vector<1x128xf32> to vector<8x128xf32>
    %142 = arith.mulf %140, %141 : vector<8x128xf32>
    %c0_66 = arith.constant 0 : index
    %c0_67 = arith.constant 0 : index
    %143 = vector.load %arg15[%c0_66, %c0_67] : memref<128x256xf32, #tpu.memory_space<vmem>>, vector<128x256xf32>
    %cst_68 = arith.constant dense<0.000000e+00> : vector<8x256xf32>
    %144 = tpu.matmul %142, %143, %cst_68 {dimension_numbers = #tpu.dot_dimension_numbers<[1], [0], [0], [1], [0, 0, 1, 1], [], []>} : vector<8x128xf32>, vector<128x256xf32>, vector<8x256xf32> -> vector<8x256xf32>
    %c0_69 = arith.constant 0 : index
    %c0_70 = arith.constant 0 : index
    %145 = vector.load %arg16[%c0_69, %c0_70] : memref<128x256xf32, #tpu.memory_space<vmem>>, vector<128x256xf32>
    %cst_71 = arith.constant dense<0.000000e+00> : vector<8x256xf32>
    %146 = tpu.matmul %142, %145, %cst_71 {dimension_numbers = #tpu.dot_dimension_numbers<[1], [0], [0], [1], [0, 0, 1, 1], [], []>} : vector<8x128xf32>, vector<128x256xf32>, vector<8x256xf32> -> vector<8x256xf32>
    %147 = arith.negf %144 : vector<8x256xf32>
    %148 = math.exp %147 : vector<8x256xf32>
    %cst_72 = arith.constant 1.000000e+00 : f32
    %149 = vector.broadcast %cst_72 : f32 to vector<8x256xf32>
    %150 = arith.addf %149, %148 : vector<8x256xf32>
    %151 = arith.divf %149, %150 : vector<8x256xf32>
    %152 = arith.mulf %144, %151 : vector<8x256xf32>
    %153 = arith.mulf %152, %146 : vector<8x256xf32>
    %c0_73 = arith.constant 0 : index
    %c0_74 = arith.constant 0 : index
    %154 = vector.load %arg17[%c0_73, %c0_74] : memref<256x128xf32, #tpu.memory_space<vmem>>, vector<256x128xf32>
    %cst_75 = arith.constant dense<0.000000e+00> : vector<8x128xf32>
    %155 = tpu.matmul %153, %154, %cst_75 {dimension_numbers = #tpu.dot_dimension_numbers<[1], [0], [0], [1], [0, 0, 1, 1], [], []>} : vector<8x256xf32>, vector<256x128xf32>, vector<8x128xf32> -> vector<8x128xf32>
    %c0_76 = arith.constant 0 : index
    %c0_77 = arith.constant 0 : index
    %156 = vector.load %arg18[%c0_76, %c0_77] : memref<8x128xf32, #tpu.memory_space<vmem>>, vector<8x128xf32>
    tpu.vector_store %arg18[%c0_76, %c0_77], %155 {strides = array<i32>} : memref<8x128xf32, #tpu.memory_space<vmem>>, vector<8x128xf32>,
    %c0_78 = arith.constant 0 : index
    %c0_79 = arith.constant 0 : index
    %157 = vector.load %arg19[%c0_78, %c0_79] : memref<8x128xf32, #tpu.memory_space<vmem>>, vector<8x128xf32>
    tpu.vector_store %arg19[%c0_78, %c0_79], %129 {strides = array<i32>} : memref<8x128xf32, #tpu.memory_space<vmem>>, vector<8x128xf32>,
    return
  }
  func.func @transform_0(%arg0: i32) -> (i32, i32) {
    %c0_i32 = arith.constant 0 : i32
    %c0_i32_0 = arith.constant 0 : i32
    %c0_i32_1 = arith.constant 0 : i32
    return %c0_i32, %c0_i32_0 : i32, i32
  }
  func.func @transform_1(%arg0: i32) -> (i32, i32) {
    %c0_i32 = arith.constant 0 : i32
    %c0_i32_0 = arith.constant 0 : i32
    %c0_i32_1 = arith.constant 0 : i32
    return %c0_i32, %c0_i32_0 : i32, i32
  }
  func.func @transform_2(%arg0: i32) -> (i32, i32) {
    %c0_i32 = arith.constant 0 : i32
    %c0_i32_0 = arith.constant 0 : i32
    %c0_i32_1 = arith.constant 0 : i32
    return %c0_i32, %c0_i32_0 : i32, i32
  }
  func.func @transform_3(%arg0: i32) -> (i32, i32) {
    %c0_i32 = arith.constant 0 : i32
    %c0_i32_0 = arith.constant 0 : i32
    %c0_i32_1 = arith.constant 0 : i32
    return %c0_i32, %c0_i32_0 : i32, i32
  }
  func.func @transform_4(%arg0: i32) -> (i32, i32) {
    %c0_i32 = arith.constant 0 : i32
    %c0_i32_0 = arith.constant 0 : i32
    %c0_i32_1 = arith.constant 0 : i32
    return %c0_i32, %c0_i32_0 : i32, i32
  }
  func.func @transform_5(%arg0: i32) -> (i32, i32) {
    %c0_i32 = arith.constant 0 : i32
    %c0_i32_0 = arith.constant 0 : i32
    %c0_i32_1 = arith.constant 0 : i32
    return %c0_i32, %c0_i32_0 : i32, i32
  }
  func.func @transform_6(%arg0: i32) -> (i32, i32) {
    %c0_i32 = arith.constant 0 : i32
    %c0_i32_0 = arith.constant 0 : i32
    %c0_i32_1 = arith.constant 0 : i32
    return %c0_i32, %c0_i32_0 : i32, i32
  }
  func.func @transform_7(%arg0: i32) -> (i32, i32) {
    %c0_i32 = arith.constant 0 : i32
    %c0_i32_0 = arith.constant 0 : i32
    %c0_i32_1 = arith.constant 0 : i32
    return %c0_i32, %c0_i32_0 : i32, i32
  }
  func.func @transform_8(%arg0: i32) -> (i32, i32) {
    %c0_i32 = arith.constant 0 : i32
    %c0_i32_0 = arith.constant 0 : i32
    %c0_i32_1 = arith.constant 0 : i32
    return %c0_i32, %c0_i32_0 : i32, i32
  }
  func.func @transform_9(%arg0: i32) -> (i32, i32) {
    %c0_i32 = arith.constant 0 : i32
    %c0_i32_0 = arith.constant 0 : i32
    %c0_i32_1 = arith.constant 0 : i32
    return %c0_i32, %c0_i32_0 : i32, i32
  }
  func.func @transform_10(%arg0: i32) -> (i32, i32) {
    %c0_i32 = arith.constant 0 : i32
    %c0_i32_0 = arith.constant 0 : i32
    %c0_i32_1 = arith.constant 0 : i32
    return %c0_i32, %c0_i32_0 : i32, i32
  }
  func.func @transform_11(%arg0: i32) -> (i32, i32) {
    %c0_i32 = arith.constant 0 : i32
    %c0_i32_0 = arith.constant 0 : i32
    %c0_i32_1 = arith.constant 0 : i32
    return %c0_i32, %c0_i32_0 : i32, i32
  }
  func.func @transform_12(%arg0: i32) -> (i32, i32) {
    %c0_i32 = arith.constant 0 : i32
    %c0_i32_0 = arith.constant 0 : i32
    %c0_i32_1 = arith.constant 0 : i32
    return %c0_i32, %c0_i32_0 : i32, i32
  }
  func.func @transform_13(%arg0: i32) -> (i32, i32) {
    %c0_i32 = arith.constant 0 : i32
    %c0_i32_0 = arith.constant 0 : i32
    %c0_i32_1 = arith.constant 0 : i32
    return %c0_i32, %c0_i32_0 : i32, i32
  }
  func.func @transform_14(%arg0: i32) -> (i32, i32) {
    %c0_i32 = arith.constant 0 : i32
    %c0_i32_0 = arith.constant 0 : i32
    %c0_i32_1 = arith.constant 0 : i32
    return %c0_i32, %c0_i32_0 : i32, i32
  }
  func.func @transform_15(%arg0: i32) -> (i32, i32) {
    %c0_i32 = arith.constant 0 : i32
    %c0_i32_0 = arith.constant 0 : i32
    %c0_i32_1 = arith.constant 0 : i32
    return %c0_i32, %c0_i32_0 : i32, i32
  }
  func.func @transform_16(%arg0: i32) -> (i32, i32) {
    %c0_i32 = arith.constant 0 : i32
    %c0_i32_0 = arith.constant 0 : i32
    %c0_i32_1 = arith.constant 0 : i32
    return %c0_i32, %c0_i32_0 : i32, i32
  }
  func.func @transform_17(%arg0: i32) -> (i32, i32) {
    %c0_i32 = arith.constant 0 : i32
    %c0_i32_0 = arith.constant 0 : i32
    %c0_i32_1 = arith.constant 0 : i32
    return %c0_i32, %c0_i32_0 : i32, i32
  }
  func.func @transform_18(%arg0: i32) -> (i32, i32) {
    %c0_i32 = arith.constant 0 : i32
    %c0_i32_0 = arith.constant 0 : i32
    %c0_i32_1 = arith.constant 0 : i32
    return %c0_i32, %c0_i32_0 : i32, i32
  }
}

</mosaic_0001>

<bundles_post_ra>
// kernel: tile.34
= control target key start
LH: loop header
LB: loop body
LE: loop exit
PB: predicated region body
PF: predicated region fallthrough
CT: control target
= control target key end

     0   :  { %vm43_vm0 = vcmask 1047556   ;;  %vm45_vm1 = vcmask 261120   ;;  %vm55_vm2 = vcmask 523520   ;;  %s112_s0 = inlined_call_operand.vmem [shape: f32[8,2,32], index: 0, kind: input, shape index: {}]   ;;  %s113_s1 = inlined_call_operand.vmem [shape: f32[8,64], index: 1, kind: output, shape index: {}]  }
   0x1   :  { %v63_v0 = vld [vmem:[%s112_s0 + $0xe] sm:$0x3]  ;;  %v64_v1 = vld [vmem:[%s112_s0 + $0xc] sm:$0x3]  ;;  %v65_v2 = vld [vmem:[%s112_s0 + $0xa] sm:$0x3] }
   0x2   :  { %9 = vst [vmem:[#allocation0 + $0x38] sm:$0x3] %v63_v0  ;;  %14 = vst [vmem:[#allocation0 + $0x30] sm:$0x3] %v64_v1  ;;  %v66_v3 = vld [vmem:[%s112_s0 + $0x8] sm:$0x3] }
   0x3   :  { %19 = vst [vmem:[#allocation0 + $0x28] sm:$0x3] %v65_v2  ;;  %v67_v4 = vld [vmem:[%s112_s0 + $0x6] sm:$0x3]  ;;  %v68_v5 = vld [vmem:[%s112_s0 + $0x4] sm:$0x3] }
   0x4   :  { %24 = vst [vmem:[#allocation0 + $0x20] sm:$0x3] %v66_v3  ;;  %29 = vst [vmem:[#allocation0 + $0x18] sm:$0x3] %v67_v4  ;;  %v69_v6 = vld [vmem:[%s112_s0 + $0x2] sm:$0x3] }
   0x5   :  { %34 = vst [vmem:[#allocation0 + $0x10] sm:$0x3] %v68_v5  ;;  %v39_v7 = vld [vmem:[%s112_s0] sm:$0x3]  ;;  %38 = vst [vmem:[#allocation0 + $0x8] sm:$0x3] %v69_v6 }
   0x6   :  { %40 = vst [vmem:[#allocation0] sm:$0x3] %v39_v7  ;;  %s71_s0 = smov 32  }
   0xb   :  { %v42_v8 = vld [vmem:[#allocation0] ss:$8 sm:$0xf0]   ;;  %v50_v9 = vld [vmem:[#allocation0 + $0x1] ss:$8 sm:$0xf0]  }
   0xd   :  { %v41_v10 = vld [vmem:[#allocation0] ss:$8 sm:$0xf]   ;;  %v48_v11 = vld [vmem:[#allocation0 + $0x1] ss:$8 sm:$0xf]  }
   0xe   :  { %v44_v12 = vsel %vm43_vm0, %v42_v8, %v41_v10  ;;  %v52_v13 = vsel %vm43_vm0, %v50_v9, %v48_v11 }
   0xf   :  { %53 = vrot.lane.b32.xlu0 %v52_v13, %s71_s0  ;;  %46 = vst.msk [vmem:[%s113_s1] sm:$0xff] %vm45_vm1, %v44_v12  }
  0x81   :  { %v54_v14 = vpop.permute.xlu0 %53  }
  0x82   :  { %56 = vst.msk [vmem:[%s113_s1] sm:$0xff] %vm55_vm2, %v54_v14  }

// kernel: tile.29
= control target key start
LH: loop header
LB: loop body
LE: loop exit
PB: predicated region body
PF: predicated region fallthrough
CT: control target
= control target key end

     0   :  { %vm43_vm0 = vcmask 1047556   ;;  %vm45_vm1 = vcmask 261120   ;;  %s94_s22 = smov 32   ;;  %s95_s25 = smov 64   ;;  %vm55_vm2 = vcmask 1048320   ;;  %vm65_vm3 = vcmask 785920   ;;  %s147_s0 = inlined_call_operand.vmem [shape: f32[8,4,32], index: 0, kind: input, shape index: {}]   ;;  %s148_s1 = inlined_call_operand.vmem [shape: f32[8,128], index: 1, kind: output, shape index: {}]  }
   0x1   :  { %v83_v0 = vld [vmem:[%s147_s0 + $0x1c] sm:$0xf]  ;;  %v84_v1 = vld [vmem:[%s147_s0 + $0x18] sm:$0xf]  ;;  %v85_v2 = vld [vmem:[%s147_s0 + $0x14] sm:$0xf] }
   0x2   :  { %9 = vst [vmem:[#allocation0 + $0x38] sm:$0xf] %v83_v0  ;;  %14 = vst [vmem:[#allocation0 + $0x30] sm:$0xf] %v84_v1  ;;  %v86_v3 = vld [vmem:[%s147_s0 + $0x10] sm:$0xf] }
   0x3   :  { %19 = vst [vmem:[#allocation0 + $0x28] sm:$0xf] %v85_v2  ;;  %v87_v4 = vld [vmem:[%s147_s0 + $0xc] sm:$0xf]  ;;  %v88_v5 = vld [vmem:[%s147_s0 + $0x8] sm:$0xf] }
   0x4   :  { %24 = vst [vmem:[#allocation0 + $0x20] sm:$0xf] %v86_v3  ;;  %29 = vst [vmem:[#allocation0 + $0x18] sm:$0xf] %v87_v4  ;;  %v89_v6 = vld [vmem:[%s147_s0 + $0x4] sm:$0xf] }
   0x5   :  { %34 = vst [vmem:[#allocation0 + $0x10] sm:$0xf] %v88_v5  ;;  %v39_v7 = vld [vmem:[%s147_s0] sm:$0xf]  ;;  %38 = vst [vmem:[#allocation0 + $0x8] sm:$0xf] %v89_v6 }
   0x6   :  { %40 = vst [vmem:[#allocation0] sm:$0xf] %v39_v7  ;;  %s93_s0 = smov 96   ;;  %vm75_vm4 = vcmask 523520  }
   0xb   :  { %v50_v8 = vld [vmem:[#allocation0 + $0x3] ss:$8 sm:$0xf0]   ;;  %v60_v9 = vld [vmem:[#allocation0 + $0x2] ss:$8 sm:$0xf0]  }
   0xc   :  { %v70_v14 = vld [vmem:[#allocation0 + $0x1] ss:$8 sm:$0xf0]   ;;  %v42_v17 = vld [vmem:[#allocation0] ss:$8 sm:$0xf0]  }
   0xd   :  { %v48_v10 = vld [vmem:[#allocation0 + $0x3] ss:$8 sm:$0xf]   ;;  %v58_v11 = vld [vmem:[#allocation0 + $0x2] ss:$8 sm:$0xf]  }
   0xe   :  { %v52_v12 = vsel %vm43_vm0, %v50_v8, %v48_v10  ;;  %v68_v13 = vld [vmem:[#allocation0 + $0x1] ss:$8 sm:$0xf]   ;;  %v41_v16 = vld [vmem:[#allocation0] ss:$8 sm:$0xf]   ;;  %v62_v18 = vsel %vm43_vm0, %v60_v9, %v58_v11 }
   0xf   :  { %53 = vrot.lane.b32.xlu0 %v52_v12, %s93_s0  ;;  %v72_v15 = vsel %vm43_vm0, %v70_v14, %v68_v13  ;;  %v44_v19 = vsel %vm43_vm0, %v42_v17, %v41_v16 }
  0x10   :  { %73 = vrot.lane.b32.xlu1 %v72_v15, %s94_s22  ;;  %46 = vst.msk [vmem:[%s148_s1] sm:$0xff] %vm45_vm1, %v44_v19  }
  0x13   :  { %63 = vrot.lane.b32.xlu0 %v62_v18, %s95_s25 }
  0x81   :  { %v54_v20 = vpop.permute.xlu0 %53  }
  0x82   :  { %56 = vst.msk [vmem:[%s148_s1] sm:$0xff] %vm55_vm2, %v54_v20   ;;  %v74_v21 = vpop.permute.xlu1 %73  }
  0x85   :  { %v64_v22 = vpop.permute.xlu0 %63  }
  0x86   :  { %66 = vst.msk [vmem:[%s148_s1] sm:$0xff] %vm65_vm3, %v64_v22  }
  0x87   :  { %76 = vst.msk [vmem:[%s148_s1] sm:$0xff] %vm75_vm4, %v74_v21  }

// kernel: decilm_decoder_layer.1
= control target key start
LH: loop header
LB: loop body
LE: loop exit
PB: predicated region body
PF: predicated region fallthrough
CT: control target
= control target key end

     0   :  { %s3248_s0 = inlined_call_operand.hbm [shape: f32[8,128], index: 0, kind: input, shape index: {}]   ;;  %s3249_s1 = inlined_call_operand.hbm [shape: f32[8,128], index: 1, kind: input, shape index: {}, may-alias: {1,18}]   ;;  %s3250_s2 = inlined_call_operand.vmem [shape: f32[1,128], index: 2, kind: input, shape index: {}]   ;;  %s3251_s3 = inlined_call_operand.vmem [shape: f32[128,128], index: 3, kind: input, shape index: {}]   ;;  %s3252_s4 = inlined_call_operand.vmem [shape: f32[128,64], index: 4, kind: input, shape index: {}]   ;;  %s3253_s5 = inlined_call_operand.vmem [shape: f32[128,64], index: 5, kind: input, shape index: {}]   ;;  %s3254_s6 = inlined_call_operand.vmem [shape: f32[8,128], index: 6, kind: input, shape index: {}]   ;;  %s3255_s7 = inlined_call_operand.vmem [shape: f32[8,128], index: 7, kind: input, shape index: {}]   ;;  %s3256_s8 = inlined_call_operand.vmem [shape: f32[8,64], index: 8, kind: input, shape index: {}]   ;;  %s3257_s9 = inlined_call_operand.vmem [shape: f32[8,64], index: 9, kind: input, shape index: {}]   ;;  %s3258_s10 = inlined_call_operand.hbm [shape: f32[128,128], index: 10, kind: input, shape index: {}]   ;;  %s3259_s11 = inlined_call_operand.vmem [shape: f32[64,64], index: 11, kind: input, shape index: {}]   ;;  %s3260_s12 = inlined_call_operand.hbm [shape: f32[128,128], index: 12, kind: input, shape index: {}]   ;;  %s3261_s13 = inlined_call_operand.vmem [shape: f32[1,128], index: 13, kind: input, shape index: {}]   ;;  %s3262_s14 = inlined_call_operand.vmem [shape: f32[128,256], index: 14, kind: input, shape index: {}]   ;;  %s3263_s15 = inlined_call_operand.vmem [shape: f32[128,256], index: 15, kind: input, shape index: {}]   ;;  %s3264_s16 = inlined_call_operand.hbm [shape: f32[256,128], index: 16, kind: input, shape index: {}]   ;;  %s3265_s17 = inlined_call_operand.hbm [shape: f32[8,128], index: 17, kind: output, shape index: {0}]   ;;  %s3266_s18 = inlined_call_operand.hbm [shape: f32[8,128], index: 18, kind: output, shape index: {1}, may-alias: {1,18}]  }
   0x1   :  { %3267 = sst [smem:[#allocation19_spill]] %s3248_s0 }
   0x2   :  { %3268 = sst [smem:[#allocation20_spill]] %s3249_s1 }
   0x3   :  { %3269 = sst [smem:[#allocation21_spill]] %s3250_s2 }
   0x4   :  { %24 = vsyncpa [#allocation3], 0 }
   0x5   :  { %25 = vsyncpa [#allocation6], 0 }
   0x6   :  { %26 = vsyncpa [#allocation9], 0 }
   0x7   :  { %27 = vsyncpa [#allocation4], 0 }
   0x8   :  { %28 = vsyncpa [#allocation13], 0  ;;  %s2523_s27 = smov [#allocation5]  }
   0x9   :  { %s45_s28 = sshll.u32 %s2523_s27, 4  ;;  %s46_s28 = int_to_ptr.vmem [resolvable:$true] %s45_s28 }
   0xa   :  { %s2381_s29 = scalar_lea.vmem %s46_s28, 128  ;;  %p2386_p1 = scmp.lt.s32.totalorder %s46_s28, %s46_s28 }
   0xb   :  { %p2382_p0 = scmp.ne.s32.totalorder %s46_s28, %s2381_s29  ;;  %p2387_p2 = scmp.lt.s32.totalorder %s2381_s29, %s2381_s29 }
   0xd   :  { %p2388_p3 = por %p2387_p2, %p2386_p1 }
   0xf   :  { %p2389_p4 = pnand %p2388_p3, %p2382_p0 }
  0x11   :  { %2392 = shalt.err (!%p2389_p4)
}
  0x12   :  { %s3270_s19 = sld [smem:[#allocation20_spill]]  ;;  %s2524_s1 = smov [#allocation8]  }
  0x13   :  { %s84_s20 = sshll.u32 %s2524_s1, 4  ;;  %s2525_s21 = smov [#allocation2]   ;;  %s85_s20 = int_to_ptr.vmem [resolvable:$true] %s84_s20 }
  0x14   :  { %s35_s22 = sshll.u32 %s2525_s21, 4  ;;  %s2401_s2 = scalar_lea.vmem %s85_s20, 2048  ;;  %s36_s22 = int_to_ptr.vmem [resolvable:$true] %s35_s22 }
  0x15   :  { %p2402_p5 = scmp.ne.s32.totalorder %s85_s20, %s2401_s2  ;;  %p2406_p6 = scmp.lt.s32.totalorder %s85_s20, %s85_s20 }
  0x16   :  { %p2407_p7 = scmp.lt.s32.totalorder %s2401_s2, %s2401_s2 }
  0x18   :  { %48 = dma.hbm_to_vmem [thread:$0]  %s3270_s19, 128, %s46_s28, [#allocation6]  }
  0x19   :  { %p2408_p8 = por %p2407_p7, %p2406_p6 }
  0x1b   :  { %p2409_p9 = pnand %p2408_p8, %p2402_p5 }
  0x1d   :  { %2412 = shalt.err (!%p2409_p9)
}
  0x1e   :  { %s2526_s23 = smov 128   ;;  %s2527_s24 = smov 8  }
  0x1f   :  { %90 = dma.hbm_to_vmem [thread:$0]  %s3260_s12, 2048, %s85_s20, [#allocation9], %s2526_s23, %s2526_s23, %s2527_s24  }
  0x20   :  { %s2421_s27 = scalar_lea.vmem %s36_s22, 128  ;;  %p2426_p11 = scmp.lt.s32.totalorder %s36_s22, %s36_s22 }
  0x21   :  { %p2422_p10 = scmp.ne.s32.totalorder %s36_s22, %s2421_s27  ;;  %p2427_p12 = scmp.lt.s32.totalorder %s2421_s27, %s2421_s27 }
  0x23   :  { %p2428_p13 = por %p2427_p12, %p2426_p11 }
  0x25   :  { %p2429_p0 = pnand %p2428_p13, %p2422_p10 }
  0x27   :  { %2432 = shalt.err (!%p2429_p0)
}
  0x28   :  { %s3271_s30 = sld [smem:[#allocation19_spill]]  ;;  %s2528_s0 = smov [#allocation7]  }
  0x29   :  { %s70_s19 = sshll.u32 %s2528_s0, 4  ;;  %s2529_s1 = smov [#allocation10]   ;;  %s71_s19 = int_to_ptr.vmem [resolvable:$true] %s70_s19 }
  0x2a   :  { %s102_s21 = sshll.u32 %s2529_s1, 4  ;;  %s2441_s2 = scalar_lea.vmem %s71_s19, 2048  ;;  %s103_s21 = int_to_ptr.vmem [resolvable:$true] %s102_s21 }
  0x2b   :  { %p2442_p1 = scmp.ne.s32.totalorder %s71_s19, %s2441_s2  ;;  %p2446_p2 = scmp.lt.s32.totalorder %s71_s19, %s71_s19 }
  0x2c   :  { %p2447_p3 = scmp.lt.s32.totalorder %s2441_s2, %s2441_s2 }
  0x2e   :  { %38 = dma.hbm_to_vmem [thread:$0]  %s3271_s30, 128, %s36_s22, [#allocation3]  }
  0x2f   :  { %p2448_p4 = por %p2447_p3, %p2446_p2 }
  0x31   :  { %p2449_p5 = pnand %p2448_p4, %p2442_p1 }
  0x33   :  { %2452 = shalt.err (!%p2449_p5)
}
  0x34   :  { %76 = dma.hbm_to_vmem [thread:$0]  %s3258_s10, 2048, %s71_s19, [#allocation6], %s2526_s23, %s2526_s23, %s2527_s24  }
  0x35   :  { %s2461_s22 = scalar_lea.vmem %s103_s21, 4096  ;;  %p2466_p7 = scmp.lt.s32.totalorder %s103_s21, %s103_s21 }
  0x36   :  { %p2462_p6 = scmp.ne.s32.totalorder %s103_s21, %s2461_s22  ;;  %p2467_p8 = scmp.lt.s32.totalorder %s2461_s22, %s2461_s22 }
  0x38   :  { %p2468_p9 = por %p2467_p8, %p2466_p7 }
  0x3a   :  { %p2469_p10 = pnand %p2468_p9, %p2462_p6 }
  0x3c   :  { %2472 = shalt.err (!%p2469_p10)
}
  0x3d   :  { %108 = dma.hbm_to_vmem [thread:$0]  %s3264_s16, 4096, %s103_s21, [#allocation9], %s2526_s23, %s2526_s23, %s2527_s24  }
  0x3e   :  { %2513 = dma.done.wait [#allocation3], 128  }
  0x3f   :  { %2514 = vsyncadd [#allocation3], 4294967168 }
  0x40   :  { %2515 = dma.done.wait [#allocation6], 2176  }
  0x41   :  { %2516 = vsyncadd [#allocation6], 4294965120 }
  0x42   :  { %2517 = dma.done.wait [#allocation9], 6144  }
  0x43   :  { %2518 = vsyncadd [#allocation9], 4294961152  ;;  %v2530_v0 = vmov 0.0   ;;  %v124_v1 = vld [vmem:[#allocation2] sm:$0xff]  ;;  %v125_v2 = vld [vmem:[#allocation5] sm:$0xff]  ;;  %vm2531_vm0 = vmmov 0  }
  0x44   :  { %2088 = vmatprep.subr.mxu0 %v2530_v0  ;;  %2123 = vmatprep.subr.mxu1 %v2530_v0  ;;  %v158_v3 = vld [vmem:[%s3251_s3 + $0x78] sm:$0xff]  ;;  %v2661_v4 = vadd.f32 %v125_v2, %v124_v1  ;;  %v157_v6 = vld [vmem:[%s3251_s3 + $0x70] sm:$0xff]  ;;  %v156_v8 = vld [vmem:[%s3251_s3 + $0x68] sm:$0xff]  ;;  %s3272_s1 = sld [smem:[#allocation21_spill]]  ;;  %vm502_vm1 = vcmask 523264   ;;  %vm600_vm2 = vcmask 261120  }
  0x45   :  { %2089 = vmatpush3.msra.mxu0 %v158_v3  ;;  %v244_v5 = vld [vmem:[%s3252_s4 + $0x78] sm:$0xff]  ;;  %v243_v7 = vld [vmem:[%s3252_s4 + $0x70] sm:$0xff]  ;;  %v242_v10 = vld [vmem:[%s3252_s4 + $0x68] sm:$0xff]  ;;  %2120 = vmatprep.mubr.msk.f32.mxu0 %vm2531_vm0, %v2530_v0  ;;  %vm679_vm4 = vcmask 64512  }
  0x46   :  { %2090 = vmatprep.subr.mxu0 %v2530_v0  ;;  %2124 = vmatpush3.msra.mxu1 %v244_v5  ;;  %v128_v9 = vmul.f32 %v2661_v4, %v2661_v4  ;;  %v155_v11 = vld [vmem:[%s3251_s3 + $0x60] sm:$0xff]  ;;  %v154_v13 = vld [vmem:[%s3251_s3 + $0x58] sm:$0xff]  ;;  %v153_v15 = vld [vmem:[%s3251_s3 + $0x50] sm:$0xff] }
  0x47   :  { %2091 = vmatpush3.msra.mxu0 %v157_v6  ;;  %2125 = vmatprep.subr.mxu1 %v2530_v0  ;;  %v241_v12 = vld [vmem:[%s3252_s4 + $0x60] sm:$0xff]  ;;  %v240_v14 = vld [vmem:[%s3252_s4 + $0x58] sm:$0xff]  ;;  %v239_v16 = vld [vmem:[%s3252_s4 + $0x50] sm:$0xff] }
  0x48   :  { %2092 = vmatprep.subr.mxu0 %v2530_v0  ;;  %2126 = vmatpush3.msra.mxu1 %v243_v7  ;;  %v152_v17 = vld [vmem:[%s3251_s3 + $0x48] sm:$0xff]  ;;  %v151_v19 = vld [vmem:[%s3251_s3 + $0x40] sm:$0xff]  ;;  %v150_v21 = vld [vmem:[%s3251_s3 + $0x38] sm:$0xff] }
  0x49   :  { %129 = vadd.xlane.f32.xlu0 %v128_v9  ;;  %2093 = vmatpush3.msra.mxu0 %v156_v8  ;;  %v238_v18 = vld [vmem:[%s3252_s4 + $0x48] sm:$0xff]  ;;  %v237_v20 = vld [vmem:[%s3252_s4 + $0x40] sm:$0xff]  ;;  %v236_v22 = vld [vmem:[%s3252_s4 + $0x38] sm:$0xff] }
  0x4a   :  { %2127 = vmatprep.subr.mxu1 %v2530_v0  ;;  %2094 = vmatprep.subr.mxu0 %v2530_v0  ;;  %v149_v23 = vld [vmem:[%s3251_s3 + $0x30] sm:$0xff]  ;;  %v148_v25 = vld [vmem:[%s3251_s3 + $0x28] sm:$0xff]  ;;  %v147_v27 = vld [vmem:[%s3251_s3 + $0x20] sm:$0xff] }
  0x4b   :  { %2128 = vmatpush3.msra.mxu1 %v242_v10  ;;  %2095 = vmatpush3.msra.mxu0 %v155_v11  ;;  %v235_v24 = vld [vmem:[%s3252_s4 + $0x30] sm:$0xff]  ;;  %v234_v26 = vld [vmem:[%s3252_s4 + $0x28] sm:$0xff]  ;;  %v233_v28 = vld [vmem:[%s3252_s4 + $0x20] sm:$0xff] }
  0x4c   :  { %2129 = vmatprep.subr.mxu1 %v2530_v0  ;;  %2096 = vmatprep.subr.mxu0 %v2530_v0  ;;  %v146_v29 = vld [vmem:[%s3251_s3 + $0x18] sm:$0xff]  ;;  %v145_v31 = vld [vmem:[%s3251_s3 + $0x10] sm:$0xff]  ;;  %v144_v33 = vld [vmem:[%s3251_s3 + $0x8] sm:$0xff] }
  0x4d   :  { %2130 = vmatpush3.msra.mxu1 %v241_v12  ;;  %2097 = vmatpush3.msra.mxu0 %v154_v13  ;;  %v232_v30 = vld [vmem:[%s3252_s4 + $0x18] sm:$0xff]  ;;  %v231_v32 = vld [vmem:[%s3252_s4 + $0x10] sm:$0xff]  ;;  %v230_v34 = vld [vmem:[%s3252_s4 + $0x8] sm:$0xff] }
  0x4e   :  { %2131 = vmatprep.subr.mxu1 %v2530_v0  ;;  %2098 = vmatprep.subr.mxu0 %v2530_v0  ;;  %v143_v35 = vld [vmem:[%s3251_s3] sm:$0xff]  ;;  %v330_v44 = vld [vmem:[%s3253_s5 + $0x78] sm:$0xff]  ;;  %v418_v45 = vld [vmem:[#allocation7 + $0x78] sm:$0xff] }
  0x4f   :  { %2132 = vmatpush3.msra.mxu1 %v240_v14  ;;  %2099 = vmatpush3.msra.mxu0 %v153_v15  ;;  %v229_v36 = vld [vmem:[%s3252_s4] sm:$0xff]  ;;  %v329_v46 = vld [vmem:[%s3253_s5 + $0x70] sm:$0xff]  ;;  %v328_v48 = vld [vmem:[%s3253_s5 + $0x68] sm:$0xff] }
  0x50   :  { %2133 = vmatprep.subr.mxu1 %v2530_v0  ;;  %2100 = vmatprep.subr.mxu0 %v2530_v0  ;;  %v1919_v41 = vld [vmem:[%s3272_s1] ss:$0 sm:$0xff]  ;;  %v416_v49 = vld [vmem:[#allocation7 + $0x68] sm:$0xff]  ;;  %v415_v51 = vld [vmem:[#allocation7 + $0x60] sm:$0xff] }
  0x51   :  { %2134 = vmatpush3.msra.mxu1 %v239_v16  ;;  %2101 = vmatpush3.msra.mxu0 %v152_v17  ;;  %v417_v47 = vld [vmem:[#allocation7 + $0x70] sm:$0xff]  ;;  %v326_v52 = vld [vmem:[%s3253_s5 + $0x58] sm:$0xff]  ;;  %v414_v53 = vld [vmem:[#allocation7 + $0x58] sm:$0xff] }
  0x52   :  { %2135 = vmatprep.subr.mxu1 %v2530_v0  ;;  %2102 = vmatprep.subr.mxu0 %v2530_v0  ;;  %v327_v50 = vld [vmem:[%s3253_s5 + $0x60] sm:$0xff]  ;;  %v325_v54 = vld [vmem:[%s3253_s5 + $0x50] sm:$0xff]  ;;  %v324_v56 = vld [vmem:[%s3253_s5 + $0x48] sm:$0xff] }
  0x53   :  { %2136 = vmatpush3.msra.mxu1 %v238_v18  ;;  %2103 = vmatpush3.msra.mxu0 %v151_v19  ;;  %v413_v55 = vld [vmem:[#allocation7 + $0x50] sm:$0xff]  ;;  %v412_v57 = vld [vmem:[#allocation7 + $0x48] sm:$0xff]  ;;  %v411_v59 = vld [vmem:[#allocation7 + $0x40] sm:$0xff] }
  0x54   :  { %2137 = vmatprep.subr.mxu1 %v2530_v0  ;;  %2104 = vmatprep.subr.mxu0 %v2530_v0  ;;  %v323_v58 = vld [vmem:[%s3253_s5 + $0x40] sm:$0xff]  ;;  %v322_v60 = vld [vmem:[%s3253_s5 + $0x38] sm:$0xff]  ;;  %v410_v61 = vld [vmem:[#allocation7 + $0x38] sm:$0xff] }
  0x55   :  { %2138 = vmatpush3.msra.mxu1 %v237_v20  ;;  %2105 = vmatpush3.msra.mxu0 %v150_v21  ;;  %v321_v62 = vld [vmem:[%s3253_s5 + $0x30] sm:$0xff]  ;;  %v409_v63 = vld [vmem:[#allocation7 + $0x30] sm:$0xff]  ;;  %v320_v1 = vld [vmem:[%s3253_s5 + $0x28] sm:$0xff] }
  0x56   :  { %2139 = vmatprep.subr.mxu1 %v2530_v0  ;;  %2106 = vmatprep.subr.mxu0 %v2530_v0  ;;  %v408_v2 = vld [vmem:[#allocation7 + $0x28] sm:$0xff]  ;;  %v319_v3 = vld [vmem:[%s3253_s5 + $0x20] sm:$0xff]  ;;  %v407_v5 = vld [vmem:[#allocation7 + $0x20] sm:$0xff] }
  0x57   :  { %2140 = vmatpush3.msra.mxu1 %v236_v22  ;;  %2107 = vmatpush3.msra.mxu0 %v149_v23  ;;  %v318_v6 = vld [vmem:[%s3253_s5 + $0x18] sm:$0xff]  ;;  %v406_v7 = vld [vmem:[#allocation7 + $0x18] sm:$0xff]  ;;  %v317_v8 = vld [vmem:[%s3253_s5 + $0x10] sm:$0xff] }
  0x58   :  { %2141 = vmatprep.subr.mxu1 %v2530_v0  ;;  %2108 = vmatprep.subr.mxu0 %v2530_v0  ;;  %v405_v9 = vld [vmem:[#allocation7 + $0x10] sm:$0xff]  ;;  %v316_v10 = vld [vmem:[%s3253_s5 + $0x8] sm:$0xff]  ;;  %v404_v11 = vld [vmem:[#allocation7 + $0x8] sm:$0xff] }
  0x59   :  { %2142 = vmatpush3.msra.mxu1 %v235_v24  ;;  %2109 = vmatpush3.msra.mxu0 %v148_v25  ;;  %v315_v12 = vld [vmem:[%s3253_s5] sm:$0xff]  ;;  %v501_v13 = vld [vmem:[%s3259_s11 + $0x38] sm:$0xff]  ;;  %v500_v14 = vld [vmem:[%s3259_s11 + $0x30] sm:$0xff] }
  0x5a   :  { %2143 = vmatprep.subr.mxu1 %v2530_v0  ;;  %2110 = vmatprep.subr.mxu0 %v2530_v0  ;;  %v499_v15 = vld [vmem:[%s3259_s11 + $0x28] sm:$0xff]  ;;  %v498_v16 = vld [vmem:[%s3259_s11 + $0x20] sm:$0xff]  ;;  %v497_v17 = vld [vmem:[%s3259_s11 + $0x18] sm:$0xff] }
  0x5b   :  { %2144 = vmatpush3.msra.mxu1 %v234_v26  ;;  %2111 = vmatpush3.msra.mxu0 %v147_v27  ;;  %v496_v18 = vld [vmem:[%s3259_s11 + $0x10] sm:$0xff]  ;;  %v495_v19 = vld [vmem:[%s3259_s11 + $0x8] sm:$0xff]  ;;  %v494_v21 = vld [vmem:[%s3259_s11] sm:$0xff] }
  0x5c   :  { %2145 = vmatprep.subr.mxu1 %v2530_v0  ;;  %2112 = vmatprep.subr.mxu0 %v2530_v0  ;;  %v403_v20 = vld [vmem:[#allocation7] sm:$0xff] }
  0x5d   :  { %2146 = vmatpush3.msra.mxu1 %v233_v28  ;;  %2113 = vmatpush3.msra.mxu0 %v146_v29  ;;  %v492_v28 = vld [vmem:[%s3256_s8] sm:$0xff]  ;;  %s2534_s8 = smov 32  }
  0x5e   :  { %2147 = vmatprep.subr.mxu1 %v2530_v0  ;;  %2114 = vmatprep.subr.mxu0 %v2530_v0  ;;  %v576_v29 = vld [vmem:[%s3257_s9] sm:$0xff] }
  0x5f   :  { %2148 = vmatpush3.msra.mxu1 %v232_v30  ;;  %2115 = vmatpush3.msra.mxu0 %v145_v31  ;;  %v489_v30 = vld [vmem:[%s3255_s7] sm:$0xff]  ;;  %s2533_s7 = smov 64  }
  0x60   :  { %2149 = vmatprep.subr.mxu1 %v2530_v0  ;;  %2116 = vmatprep.subr.mxu0 %v2530_v0 }
  0x61   :  { %2150 = vmatpush3.msra.mxu1 %v231_v32  ;;  %2117 = vmatpush3.msra.mxu0 %v144_v33  ;;  %v401_v33 = vld [vmem:[%s3254_s6] sm:$0xff]  ;;  %s2532_s6 = smov 96  }
  0x62   :  { %2151 = vmatprep.subr.mxu1 %v2530_v0  ;;  %2118 = vmatprep.subr.mxu0 %v2530_v0 }
  0x63   :  { %2152 = vmatpush3.msra.mxu1 %v230_v34  ;;  %2119 = vmatpush3.msra.mxu0 %v143_v35 }
  0x64   :  { %2153 = vmatprep.subr.mxu1 %v2530_v0  ;;  %2155 = vmatprep.mubr.msk.f32.mxu1 %vm2531_vm0, %v2530_v0 }
  0x65   :  { %2154 = vmatpush3.msra.mxu1 %v229_v36  ;;  %2158 = vmatprep.subr.mxu0 %v2530_v0 }
  0x66   :  { %2193 = vmatprep.subr.mxu1 %v2530_v0 }
  0xd2   :  { %v130_v37 = vpop.xlane.xlu0 %129 }
  0xd3   :  { %v132_v38 = vmul.f32 0.0078125, %v130_v37 }
  0xd5   :  { %v133_v39 = vadd.f32 1e-05, %v132_v38 }
  0xd7   :  { %2345 = vrsqrt.f32 %v133_v39 }
  0xe4   :  { %v2346_v40 = vpop.eup %2345 }
  0xe5   :  { %v135_v42 = vmul.f32 %v2346_v40, %v2661_v4 }
  0xe7   :  { %v2798_v43 = vmul.f32 %v1919_v41, %v135_v42  ;;  %v579_v42 = vlaneseq }
  0xe9   :  { %2121 = vmatmul.mubr.f32.vlgmr.msra.gmra.mxu0 %v2798_v43  ;;  %2156 = vmatmul.mubr.f32.vlgmr.msra.gmra.mxu1 %v2798_v43 }
  0xea   :  { %2159 = vmatpush3.msra.mxu0 %v330_v44  ;;  %2190 = vmatprep.mubr.msk.f32.mxu0 %vm2531_vm0, %v2530_v0  ;;  %v2951_v44 = vand.u32 127, %v579_v42 }
  0xeb   :  { %2160 = vmatprep.subr.mxu0 %v2530_v0  ;;  %2194 = vmatpush3.msra.mxu1 %v418_v45 }
  0xec   :  { %2161 = vmatpush3.msra.mxu0 %v329_v46  ;;  %2195 = vmatprep.subr.mxu1 %v2530_v0 }
  0xed   :  { %2162 = vmatprep.subr.mxu0 %v2530_v0  ;;  %2196 = vmatpush3.msra.mxu1 %v417_v47 }
  0xee   :  { %2163 = vmatpush3.msra.mxu0 %v328_v48  ;;  %2197 = vmatprep.subr.mxu1 %v2530_v0 }
  0xef   :  { %2164 = vmatprep.subr.mxu0 %v2530_v0  ;;  %2198 = vmatpush3.msra.mxu1 %v416_v49 }
  0xf0   :  { %2165 = vmatpush3.msra.mxu0 %v327_v50  ;;  %2199 = vmatprep.subr.mxu1 %v2530_v0 }
  0xf1   :  { %2166 = vmatprep.subr.mxu0 %v2530_v0  ;;  %2200 = vmatpush3.msra.mxu1 %v415_v51 }
  0xf2   :  { %2167 = vmatpush3.msra.mxu0 %v326_v52  ;;  %2201 = vmatprep.subr.mxu1 %v2530_v0 }
  0xf3   :  { %2168 = vmatprep.subr.mxu0 %v2530_v0  ;;  %2202 = vmatpush3.msra.mxu1 %v414_v53 }
  0xf4   :  { %2169 = vmatpush3.msra.mxu0 %v325_v54  ;;  %2203 = vmatprep.subr.mxu1 %v2530_v0 }
  0xf5   :  { %2170 = vmatprep.subr.mxu0 %v2530_v0  ;;  %2204 = vmatpush3.msra.mxu1 %v413_v55 }
  0xf6   :  { %2171 = vmatpush3.msra.mxu0 %v324_v56  ;;  %2205 = vmatprep.subr.mxu1 %v2530_v0 }
  0xf7   :  { %2172 = vmatprep.subr.mxu0 %v2530_v0  ;;  %2206 = vmatpush3.msra.mxu1 %v412_v57 }
  0xf8   :  { %2173 = vmatpush3.msra.mxu0 %v323_v58  ;;  %2207 = vmatprep.subr.mxu1 %v2530_v0 }
  0xf9   :  { %2174 = vmatprep.subr.mxu0 %v2530_v0  ;;  %2208 = vmatpush3.msra.mxu1 %v411_v59 }
  0xfa   :  { %2175 = vmatpush3.msra.mxu0 %v322_v60  ;;  %2209 = vmatprep.subr.mxu1 %v2530_v0 }
  0xfb   :  { %2176 = vmatprep.subr.mxu0 %v2530_v0  ;;  %2210 = vmatpush3.msra.mxu1 %v410_v61 }
  0xfc   :  { %2177 = vmatpush3.msra.mxu0 %v321_v62  ;;  %2211 = vmatprep.subr.mxu1 %v2530_v0 }
  0xfd   :  { %2178 = vmatprep.subr.mxu0 %v2530_v0  ;;  %2212 = vmatpush3.msra.mxu1 %v409_v63 }
  0xfe   :  { %2179 = vmatpush3.msra.mxu0 %v320_v1  ;;  %2213 = vmatprep.subr.mxu1 %v2530_v0 }
  0xff   :  { %2180 = vmatprep.subr.mxu0 %v2530_v0  ;;  %2214 = vmatpush3.msra.mxu1 %v408_v2 }
 0x100   :  { %2181 = vmatpush3.msra.mxu0 %v319_v3  ;;  %2215 = vmatprep.subr.mxu1 %v2530_v0 }
 0x101   :  { %2182 = vmatprep.subr.mxu0 %v2530_v0  ;;  %2216 = vmatpush3.msra.mxu1 %v407_v5 }
 0x102   :  { %2183 = vmatpush3.msra.mxu0 %v318_v6  ;;  %2217 = vmatprep.subr.mxu1 %v2530_v0 }
 0x103   :  { %2184 = vmatprep.subr.mxu0 %v2530_v0  ;;  %2218 = vmatpush3.msra.mxu1 %v406_v7 }
 0x104   :  { %2185 = vmatpush3.msra.mxu0 %v317_v8  ;;  %2219 = vmatprep.subr.mxu1 %v2530_v0 }
 0x105   :  { %2186 = vmatprep.subr.mxu0 %v2530_v0  ;;  %2220 = vmatpush3.msra.mxu1 %v405_v9  ;;  %v591_v9 = vld [vmem:[#allocation8 + $0x38] sm:$0xff] }
 0x106   :  { %2187 = vmatpush3.msra.mxu0 %v316_v10  ;;  %2221 = vmatprep.subr.mxu1 %v2530_v0  ;;  %v590_v10 = vld [vmem:[#allocation8 + $0x30] sm:$0xff] }
 0x107   :  { %2188 = vmatprep.subr.mxu0 %v2530_v0  ;;  %2222 = vmatpush3.msra.mxu1 %v404_v11  ;;  %v589_v11 = vld [vmem:[#allocation8 + $0x28] sm:$0xff] }
 0x108   :  { %2189 = vmatpush3.msra.mxu0 %v315_v12  ;;  %2223 = vmatprep.subr.mxu1 %v2530_v0  ;;  %v588_v12 = vld [vmem:[#allocation8 + $0x20] sm:$0xff] }
 0x109   :  { %2191 = vmatmul.mubr.f32.vlgmr.msra.gmra.mxu0 %v2798_v43  ;;  %2228 = vmatprep.subr.mxu0 %v2530_v0  ;;  %v2949_v43 = vshrl.u32 %v579_v42, 7  ;;  %v595_v42 = vld [vmem:[#allocation8 + $0x58] sm:$0xff] }
 0x10a   :  { %2229 = vmatpush3.msra.mxu0 %v501_v13  ;;  %2225 = vmatprep.mubr.msk.f32.mxu1 %vm2531_vm0, %v2530_v0 }
 0x10b   :  { %2230 = vmatprep.subr.mxu0 %v2530_v0  ;;  %2244 = vmatprep.mubr.msk.f32.mxu0 %vm2531_vm0, %v2530_v0  ;;  %vm583_vm3 = vcmp.le.s32.totalorder %v2951_v44, %v2949_v43  ;;  %v597_v43 = vld [vmem:[#allocation8 + $0x68] sm:$0xff] }
 0x10c   :  { %2231 = vmatpush3.msra.mxu0 %v500_v14  ;;  %2224 = vmatpush3.msra.mxu1 %v403_v20  ;;  %v585_v20 = vld [vmem:[#allocation8 + $0x8] sm:$0xff] }
 0x10d   :  { %2232 = vmatprep.subr.mxu0 %v2530_v0  ;;  %2252 = vmatprep.subr.mxu1 %v2530_v0 }
 0x10e   :  { %2233 = vmatpush3.msra.mxu0 %v499_v15 }
 0x10f   :  { %2234 = vmatprep.subr.mxu0 %v2530_v0 }
 0x110   :  { %2235 = vmatpush3.msra.mxu0 %v498_v16  ;;  %v587_v16 = vld [vmem:[#allocation8 + $0x18] sm:$0xff] }
 0x111   :  { %2236 = vmatprep.subr.mxu0 %v2530_v0 }
 0x112   :  { %2237 = vmatpush3.msra.mxu0 %v497_v17 }
 0x113   :  { %2238 = vmatprep.subr.mxu0 %v2530_v0 }
 0x114   :  { %2239 = vmatpush3.msra.mxu0 %v496_v18  ;;  %v586_v18 = vld [vmem:[#allocation8 + $0x10] sm:$0xff] }
 0x115   :  { %2240 = vmatprep.subr.mxu0 %v2530_v0 }
 0x116   :  { %2241 = vmatpush3.msra.mxu0 %v495_v19 }
 0x117   :  { %2242 = vmatprep.subr.mxu0 %v2530_v0 }
 0x118   :  { %2243 = vmatpush3.msra.mxu0 %v494_v21  ;;  %v584_v21 = vld [vmem:[#allocation8] sm:$0xff] }
 0x119   :  { %2247 = vmatprep.subr.mxu0 %v2530_v0 }
 0x1a9   :  { %v225_v22 = vpop.f32.mrf.mxu0  ;;  %v311_v23 = vpop.f32.mrf.mxu1 }
 0x1aa   :  { %2226 = vmatmul.mubr.f32.vlgmr.msra.gmra.mxu1 %v225_v22  ;;  %2245 = vmatmul.mubr.msk.f32.vlgmr.msra.gmra.mxu0 %vm502_vm1, %v311_v23  ;;  %v493_v34 = vmul.f32 %v492_v28, %v311_v23  ;;  %v402_v40 = vmul.f32 %v401_v33, %v225_v22 }
 0x1ab   :  { %v2122_v24 = vpop.f32.mrf.mxu0  ;;  %v2157_v25 = vpop.f32.mrf.mxu1  ;;  %2249 = vmatprep.mubr.msk.f32.mxu0 %vm2531_vm0, %v2530_v0  ;;  %2254 = vmatprep.mubr.msk.f32.mxu1 %vm2531_vm0, %v2530_v0 }
 0x1c9   :  { %v2925_v26 = vpop.f32.mrf.mxu0 }
 0x1ca   :  { %2253 = vmatpush3.msra.mxu1 %v2925_v26 }
 0x1cb   :  { %v2192_v27 = vpop.f32.mrf.mxu0  ;;  %2257 = vmatprep.subr.mxu1 %v2530_v0 }
 0x26a   :  { %v485_v31 = vpop.f32.mrf.mxu1  ;;  %v572_v32 = vpop.f32.mrf.mxu0 }
 0x26b   :  { %v577_v35 = vmul.f32 %v576_v29, %v572_v32  ;;  %v490_v36 = vmul.f32 %v489_v30, %v485_v31 }
 0x26c   :  { %v2227_v37 = vpop.f32.mrf.mxu1  ;;  %v2246_v38 = vpop.f32.mrf.mxu0 }
 0x26d   :  { %v578_v39 = vadd.f32 %v577_v35, %v493_v34  ;;  %v2942_v41 = vadd.f32 %v490_v36, %v402_v40 }
 0x26f   :  { %2248 = vmatpush3.xpose.msk.msra.mxu0 %vm600_vm2, %v578_v39 }
 0x270   :  { %2267 = vmatprep.subr.mxu0 %v2530_v0 }
 0x272   :  { %2250 = vmatmul.mubr.msk.f32.vlgmr.msra.gmra.mxu0 %vm600_vm2, %v2942_v41 }
 0x273   :  { %2275 = vmatprep.mubr.msk.f32.mxu0 %vm2531_vm0, %v2530_v0  ;;  %2268 = vmatpush3.msra.mxu0 %v591_v9 }
 0x274   :  { %2269 = vmatprep.subr.mxu0 %v2530_v0 }
 0x275   :  { %2270 = vmatpush3.msra.mxu0 %v590_v10  ;;  %v1593_v10 = vld [vmem:[%s3262_s14 + $0xf8] sm:$0xff] }
 0x276   :  { %2271 = vmatprep.subr.mxu0 %v2530_v0 }
 0x277   :  { %2272 = vmatpush3.msra.mxu0 %v589_v11  ;;  %v1696_v11 = vld [vmem:[%s3263_s15 + $0xf8] sm:$0xff] }
 0x278   :  { %2273 = vmatprep.subr.mxu0 %v2530_v0 }
 0x279   :  { %2274 = vmatpush3.msra.mxu0 %v588_v12  ;;  %v1592_v12 = vld [vmem:[%s3262_s14 + $0xf0] sm:$0xff] }
 0x27a   :  { %2278 = vmatprep.subr.mxu0 %v2530_v0 }
 0x332   :  { %v673_v45 = vpop.f32.mrf.mxu0 }
 0x333   :  { %v677_v46 = vmul.f32 0.17677669, %v673_v45  ;;  %v594_v45 = vld [vmem:[#allocation8 + $0x50] sm:$0xff] }
 0x334   :  { %v2251_v47 = vpop.f32.mrf.mxu0 }
 0x335   :  { %v678_v48 = vsel %vm583_vm3, %v677_v46, -1e+30 }
 0x336   :  { %v680_v49 = vsel %vm679_vm4, %v678_v48, -inf }
 0x337   :  { %681 = vmax.xlane.f32.xlu0 %v680_v49  ;;  %v592_v49 = vld [vmem:[#allocation8 + $0x40] sm:$0xff] }
 0x3c0   :  { %v682_v50 = vpop.xlane.xlu0 %681 }
 0x3c1   :  { %v683_v51 = vsub.f32 %v678_v48, %v682_v50 }
 0x3c3   :  { %v684_v52 = vmul.f32 1.442695, %v683_v51 }
 0x3c5   :  { %2347 = vpow2.f32 %v684_v52 }
 0x3d2   :  { %v2348_v53 = vpop.eup %2347 }
 0x3d3   :  { %v686_v54 = vsel %vm679_vm4, %v2348_v53, 0.0 }
 0x3d4   :  { %687 = vadd.xlane.f32.xlu1 %v686_v54 }
 0x3e5   :  { %764 = vrot.lane.b32.xlu1 %v2942_v41, %s2532_s6 }
 0x3e9   :  { %1070 = vrot.lane.b32.xlu1 %v2942_v41, %s2533_s7 }
 0x45d   :  { %v688_v55 = vpop.xlane.xlu1 %687 }
 0x45e   :  { %2349 = vrcp.f32 %v688_v55 }
 0x461   :  { %v765_v58 = vpop.permute.xlu1 %764 }
 0x465   :  { %v1071_v23 = vpop.permute.xlu1 %1070 }
 0x46b   :  { %v2350_v56 = vpop.eup %2349 }
 0x46c   :  { %v690_v57 = vmul.f32 %v2350_v56, %v2348_v53 }
 0x46e   :  { %2255 = vmatmul.mubr.msk.f32.vlgmr.msra.gmra.mxu1 %vm679_vm4, %v690_v57 }
 0x46f   :  { %2258 = vmatpush3.xpose.msk.msra.mxu1 %vm600_vm2, %v578_v39  ;;  %2259 = vmatprep.mubr.msk.f32.mxu1 %vm2531_vm0, %v2530_v0 }
 0x470   :  { %2262 = vmatprep.subr.mxu1 %v2530_v0 }
 0x472   :  { %2260 = vmatmul.mubr.msk.f32.vlgmr.msra.gmra.mxu1 %vm600_vm2, %v765_v58 }
 0x473   :  { %2263 = vmatpush3.msra.mxu1 %v2925_v26  ;;  %2264 = vmatprep.mubr.msk.f32.mxu1 %vm2531_vm0, %v2530_v0 }
 0x474   :  { %2294 = vmatprep.subr.mxu1 %v2530_v0 }
 0x52e   :  { %v760_v59 = vpop.f32.mrf.mxu1 }
 0x530   :  { %v2256_v60 = vpop.f32.mrf.mxu1 }
 0x532   :  { %v834_v61 = vpop.f32.mrf.mxu1 }
 0x533   :  { %v838_v62 = vmul.f32 0.17677669, %v834_v61 }
 0x534   :  { %v2261_v63 = vpop.f32.mrf.mxu1 }
 0x535   :  { %v839_v1 = vsel %vm583_vm3, %v838_v62, -1e+30  ;;  %v599_v62 = vld [vmem:[#allocation8 + $0x78] sm:$0xff]  ;;  %v598_v63 = vld [vmem:[#allocation8 + $0x70] sm:$0xff] }
 0x536   :  { %v840_v2 = vsel %vm679_vm4, %v839_v1, -inf }
 0x537   :  { %841 = vmax.xlane.f32.xlu0 %v840_v2 }
 0x5c0   :  { %v842_v3 = vpop.xlane.xlu0 %841 }
 0x5c1   :  { %v843_v5 = vsub.f32 %v839_v1, %v842_v3 }
 0x5c3   :  { %v844_v6 = vmul.f32 1.442695, %v843_v5 }
 0x5c5   :  { %2351 = vpow2.f32 %v844_v6 }
 0x5d2   :  { %v2352_v7 = vpop.eup %2351 }
 0x5d3   :  { %v846_v8 = vsel %vm679_vm4, %v2352_v7, 0.0 }
 0x5d4   :  { %847 = vadd.xlane.f32.xlu0 %v846_v8 }
 0x5ea   :  { %1072 = vrot.lane.b32.xlu0 %v578_v39, %s2532_s6 }
 0x65d   :  { %v848_v13 = vpop.xlane.xlu0 %847 }
 0x65e   :  { %2353 = vrcp.f32 %v848_v13  ;;  %v1695_v13 = vld [vmem:[%s3263_s15 + $0xf0] sm:$0xff] }
 0x661   :  { %v1073_v22 = vpop.permute.xlu0 %1072 }
 0x66b   :  { %v2354_v14 = vpop.eup %2353 }
 0x66c   :  { %v850_v15 = vmul.f32 %v2354_v14, %v2352_v7  ;;  %v596_v7 = vld [vmem:[#allocation8 + $0x60] sm:$0xff]  ;;  %v1694_v14 = vld [vmem:[%s3263_s15 + $0xe8] sm:$0xff] }
 0x66e   :  { %2265 = vmatmul.mubr.msk.f32.vlgmr.msra.gmra.mxu1 %vm679_vm4, %v850_v15  ;;  %v1590_v15 = vld [vmem:[%s3262_s14 + $0xe0] sm:$0xff] }
 0x66f   :  { %2296 = vmatprep.mubr.msk.f32.mxu1 %vm2531_vm0, %v2530_v0 }
 0x72e   :  { %v920_v17 = vpop.f32.mrf.mxu1 }
 0x72f   :  { %2276 = vmatmul.mubr.msk.f32.vlgmr.msra.gmra.mxu0 %vm600_vm2, %v920_v17  ;;  %v1589_v17 = vld [vmem:[%s3262_s14 + $0xd8] sm:$0xff] }
 0x730   :  { %2279 = vmatpush3.msra.mxu0 %v587_v16  ;;  %v2266_v19 = vpop.f32.mrf.mxu1  ;;  %2286 = vmatprep.mubr.msk.f32.mxu0 %vm2531_vm0, %v2530_v0  ;;  %v1693_v16 = vld [vmem:[%s3263_s15 + $0xe0] sm:$0xff] }
 0x731   :  { %2280 = vmatprep.subr.mxu0 %v2530_v0  ;;  %v1588_v19 = vld [vmem:[%s3262_s14 + $0xd0] sm:$0xff] }
 0x732   :  { %2281 = vmatpush3.msra.mxu0 %v586_v18  ;;  %v1692_v18 = vld [vmem:[%s3263_s15 + $0xd8] sm:$0xff] }
 0x733   :  { %2282 = vmatprep.subr.mxu0 %v2530_v0 }
 0x734   :  { %2283 = vmatpush3.msra.mxu0 %v585_v20  ;;  %v1691_v20 = vld [vmem:[%s3263_s15 + $0xd0] sm:$0xff] }
 0x735   :  { %2284 = vmatprep.subr.mxu0 %v2530_v0 }
 0x736   :  { %2285 = vmatpush3.msra.mxu0 %v584_v21  ;;  %v1587_v21 = vld [vmem:[%s3262_s14 + $0xc8] sm:$0xff] }
 0x737   :  { %2287 = vmatmul.mubr.msk.f32.vlgmr.msra.gmra.mxu0 %vm600_vm2, %v760_v59  ;;  %2289 = vmatprep.subr.mxu0 %v2530_v0 }
 0x738   :  { %2290 = vmatpush3.xpose.msk.msra.mxu0 %vm600_vm2, %v1073_v22  ;;  %2291 = vmatprep.mubr.msk.f32.mxu0 %vm2531_vm0, %v2530_v0 }
 0x739   :  { %2299 = vmatprep.subr.mxu0 %v2530_v0 }
 0x73b   :  { %2292 = vmatmul.mubr.msk.f32.vlgmr.msra.gmra.mxu0 %vm600_vm2, %v1071_v23  ;;  %v1586_v23 = vld [vmem:[%s3262_s14 + $0xc0] sm:$0xff] }
 0x73c   :  { %2307 = vmatprep.mubr.msk.f32.mxu0 %vm2531_vm0, %v2530_v0  ;;  %2300 = vmatpush3.msra.mxu0 %v595_v42  ;;  %v1683_v42 = vld [vmem:[%s3263_s15 + $0x90] sm:$0xff] }
 0x73d   :  { %2301 = vmatprep.subr.mxu0 %v2530_v0 }
 0x73e   :  { %2302 = vmatpush3.msra.mxu0 %v594_v45  ;;  %v1579_v45 = vld [vmem:[%s3262_s14 + $0x88] sm:$0xff] }
 0x73f   :  { %2303 = vmatprep.subr.mxu0 %v2530_v0 }
 0x7ef   :  { %v993_v24 = vpop.f32.mrf.mxu0 }
 0x7f1   :  { %v2277_v25 = vpop.f32.mrf.mxu0 }
 0x7f2   :  { %v1585_v25 = vld [vmem:[%s3262_s14 + $0xb8] sm:$0xff] }
 0x7f7   :  { %v1066_v27 = vpop.f32.mrf.mxu0 }
 0x7f8   :  { %v3001_v28 = vadd.f32 %v1066_v27, %v993_v24  ;;  %v1689_v24 = vld [vmem:[%s3263_s15 + $0xc0] sm:$0xff]  ;;  %v1688_v27 = vld [vmem:[%s3263_s15 + $0xb8] sm:$0xff] }
 0x7f9   :  { %v2288_v29 = vpop.f32.mrf.mxu0 }
 0x7fa   :  { %v1687_v29 = vld [vmem:[%s3263_s15 + $0xb0] sm:$0xff] }
 0x7fb   :  { %v1144_v30 = vpop.f32.mrf.mxu0 }
 0x7fc   :  { %v1148_v31 = vmul.f32 0.17677669, %v1144_v30 }
 0x7fd   :  { %v2293_v32 = vpop.f32.mrf.mxu0 }
 0x7fe   :  { %v1149_v33 = vsel %vm583_vm3, %v1148_v31, -1e+30 }
 0x7ff   :  { %v1150_v34 = vsel %vm679_vm4, %v1149_v33, -inf }
 0x800   :  { %1151 = vmax.xlane.f32.xlu1 %v1150_v34 }
 0x811   :  { %1162 = vrot.lane.b32.xlu1 %v2925_v26, %s2532_s6  ;;  %v593_v26 = vld [vmem:[#allocation8 + $0x48] sm:$0xff] }
 0x812   :  { %2304 = vmatpush3.msra.mxu0 %v593_v26  ;;  %v1682_v26 = vld [vmem:[%s3263_s15 + $0x88] sm:$0xff] }
 0x813   :  { %2305 = vmatprep.subr.mxu0 %v2530_v0 }
 0x814   :  { %2306 = vmatpush3.msra.mxu0 %v592_v49  ;;  %v1576_v49 = vld [vmem:[%s3262_s14 + $0x70] sm:$0xff] }
 0x815   :  { %2320 = vmatprep.subr.mxu0 %v2530_v0 }
 0x889   :  { %v1152_v35 = vpop.xlane.xlu1 %1151 }
 0x88a   :  { %v1153_v36 = vsub.f32 %v1149_v33, %v1152_v35  ;;  %v1583_v35 = vld [vmem:[%s3262_s14 + $0xa8] sm:$0xff] }
 0x88c   :  { %v1154_v37 = vmul.f32 1.442695, %v1153_v36  ;;  %v1686_v36 = vld [vmem:[%s3263_s15 + $0xa8] sm:$0xff] }
 0x88d   :  { %v1163_v38 = vpop.permute.xlu1 %1162 }
 0x88e   :  { %2355 = vpow2.f32 %v1154_v37  ;;  %2295 = vmatpush3.msra.mxu1 %v1163_v38  ;;  %v1685_v37 = vld [vmem:[%s3263_s15 + $0xa0] sm:$0xff] }
 0x88f   :  { %2310 = vmatprep.subr.mxu1 %v2530_v0 }
 0x89b   :  { %v2356_v39 = vpop.eup %2355 }
 0x89c   :  { %v1156_v40 = vsel %vm679_vm4, %v2356_v39, 0.0 }
 0x89d   :  { %1157 = vadd.xlane.f32.xlu0 %v1156_v40  ;;  %v1580_v40 = vld [vmem:[%s3262_s14 + $0x90] sm:$0xff] }
 0x8b3   :  { %1312 = vrot.lane.b32.xlu0 %v2942_v41, %s2534_s8 }
 0x926   :  { %v1158_v46 = vpop.xlane.xlu0 %1157 }
 0x927   :  { %2357 = vrcp.f32 %v1158_v46  ;;  %v1578_v46 = vld [vmem:[%s3262_s14 + $0x80] sm:$0xff] }
 0x92a   :  { %v1313_v41 = vpop.permute.xlu0 %1312 }
 0x934   :  { %v2358_v47 = vpop.eup %2357 }
 0x935   :  { %v1160_v48 = vmul.f32 %v2358_v47, %v2356_v39  ;;  %v1684_v39 = vld [vmem:[%s3263_s15 + $0x98] sm:$0xff]  ;;  %v1681_v47 = vld [vmem:[%s3263_s15 + $0x80] sm:$0xff] }
 0x937   :  { %2297 = vmatmul.mubr.msk.f32.vlgmr.msra.gmra.mxu1 %vm679_vm4, %v1160_v48  ;;  %v1577_v48 = vld [vmem:[%s3262_s14 + $0x78] sm:$0xff] }
 0x938   :  { %2311 = vmatpush3.xpose.msk.msra.mxu1 %vm600_vm2, %v1073_v22  ;;  %2312 = vmatprep.mubr.msk.f32.mxu1 %vm2531_vm0, %v2530_v0  ;;  %v1690_v22 = vld [vmem:[%s3263_s15 + $0xc8] sm:$0xff] }
 0x939   :  { %2315 = vmatprep.subr.mxu1 %v2530_v0 }
 0x93b   :  { %2313 = vmatmul.mubr.msk.f32.vlgmr.msra.gmra.mxu1 %vm600_vm2, %v1313_v41  ;;  %v1680_v41 = vld [vmem:[%s3263_s15 + $0x78] sm:$0xff] }
 0x93c   :  { %2316 = vmatpush3.msra.mxu1 %v1163_v38  ;;  %2317 = vmatprep.mubr.msk.f32.mxu1 %vm2531_vm0, %v2530_v0  ;;  %v1581_v38 = vld [vmem:[%s3262_s14 + $0x98] sm:$0xff] }
 0x93d   :  { %1594 = vmatprep.subr.mxu1 %v1593_v10  ;;  %v1667_v10 = vld [vmem:[%s3263_s15 + $0x10] sm:$0xff] }
 0x9f7   :  { %v1234_v50 = vpop.f32.mrf.mxu1 }
 0x9f8   :  { %2308 = vmatmul.mubr.msk.f32.vlgmr.msra.gmra.mxu0 %vm600_vm2, %v1234_v50  ;;  %v1679_v50 = vld [vmem:[%s3263_s15 + $0x70] sm:$0xff] }
 0x9f9   :  { %v2298_v51 = vpop.f32.mrf.mxu1  ;;  %2328 = vmatprep.mubr.msk.f32.mxu0 %vm2531_vm0, %v2530_v0  ;;  %2321 = vmatpush3.msra.mxu0 %v599_v62  ;;  %v1673_v62 = vld [vmem:[%s3263_s15 + $0x40] sm:$0xff] }
 0x9fa   :  { %2322 = vmatprep.subr.mxu0 %v2530_v0  ;;  %v1575_v51 = vld [vmem:[%s3262_s14 + $0x68] sm:$0xff] }
 0x9fb   :  { %v1382_v52 = vpop.f32.mrf.mxu1  ;;  %2323 = vmatpush3.msra.mxu0 %v598_v63  ;;  %v1569_v63 = vld [vmem:[%s3262_s14 + $0x38] sm:$0xff] }
 0x9fc   :  { %v1386_v53 = vmul.f32 0.17677669, %v1382_v52  ;;  %2324 = vmatprep.subr.mxu0 %v2530_v0  ;;  %v1678_v52 = vld [vmem:[%s3263_s15 + $0x68] sm:$0xff] }
 0x9fd   :  { %v2314_v54 = vpop.f32.mrf.mxu1  ;;  %2325 = vmatpush3.msra.mxu0 %v597_v43  ;;  %v1671_v43 = vld [vmem:[%s3263_s15 + $0x30] sm:$0xff] }
 0x9fe   :  { %v1387_v55 = vsel %vm583_vm3, %v1386_v53, -1e+30  ;;  %2326 = vmatprep.subr.mxu0 %v2530_v0  ;;  %v1574_v53 = vld [vmem:[%s3262_s14 + $0x60] sm:$0xff] }
 0x9ff   :  { %v1388_v56 = vsel %vm679_vm4, %v1387_v55, -inf  ;;  %2327 = vmatpush3.msra.mxu0 %v596_v7  ;;  %v1677_v54 = vld [vmem:[%s3263_s15 + $0x60] sm:$0xff]  ;;  %v1565_v7 = vld [vmem:[%s3262_s14 + $0x18] sm:$0xff] }
 0xa00   :  { %1389 = vmax.xlane.f32.xlu1 %v1388_v56  ;;  %1697 = vmatprep.subr.mxu0 %v1696_v11  ;;  %v1676_v56 = vld [vmem:[%s3263_s15 + $0x58] sm:$0xff]  ;;  %v1563_v11 = vld [vmem:[%s3262_s14 + $0x8] sm:$0xff] }
 0xa89   :  { %v1390_v57 = vpop.xlane.xlu1 %1389 }
 0xa8a   :  { %v1391_v58 = vsub.f32 %v1387_v55, %v1390_v57  ;;  %v1573_v55 = vld [vmem:[%s3262_s14 + $0x58] sm:$0xff]  ;;  %v1572_v57 = vld [vmem:[%s3262_s14 + $0x50] sm:$0xff] }
 0xa8c   :  { %v1392_v59 = vmul.f32 1.442695, %v1391_v58  ;;  %v1675_v58 = vld [vmem:[%s3263_s15 + $0x50] sm:$0xff] }
 0xa8e   :  { %2359 = vpow2.f32 %v1392_v59  ;;  %v1571_v59 = vld [vmem:[%s3262_s14 + $0x48] sm:$0xff] }
 0xa9b   :  { %v2360_v60 = vpop.eup %2359 }
 0xa9c   :  { %v1394_v61 = vsel %vm679_vm4, %v2360_v60, 0.0 }
 0xa9d   :  { %1395 = vadd.xlane.f32.xlu0 %v1394_v61  ;;  %v1570_v61 = vld [vmem:[%s3262_s14 + $0x40] sm:$0xff] }
 0xab8   :  { %v1307_v1 = vpop.f32.mrf.mxu0 }
 0xab9   :  { %v1311_v2 = vadd.f32 %v1307_v1, %v3001_v28  ;;  %v1584_v28 = vld [vmem:[%s3262_s14 + $0xb0] sm:$0xff]  ;;  %v1672_v1 = vld [vmem:[%s3263_s15 + $0x38] sm:$0xff] }
 0xaba   :  { %v2309_v44 = vpop.f32.mrf.mxu0 }
 0xabb   :  { %v1567_v44 = vld [vmem:[%s3262_s14 + $0x28] sm:$0xff] }
 0xb26   :  { %v1396_v3 = vpop.xlane.xlu0 %1395 }
 0xb27   :  { %2361 = vrcp.f32 %v1396_v3  ;;  %v1670_v3 = vld [vmem:[%s3263_s15 + $0x28] sm:$0xff] }
 0xb34   :  { %v2362_v5 = vpop.eup %2361 }
 0xb35   :  { %v1398_v6 = vmul.f32 %v2362_v5, %v2360_v60  ;;  %v1674_v60 = vld [vmem:[%s3263_s15 + $0x48] sm:$0xff]  ;;  %v1566_v5 = vld [vmem:[%s3262_s14 + $0x20] sm:$0xff] }
 0xb37   :  { %2318 = vmatmul.mubr.msk.f32.vlgmr.msra.gmra.mxu1 %vm679_vm4, %v1398_v6  ;;  %v1669_v6 = vld [vmem:[%s3263_s15 + $0x20] sm:$0xff] }
 0xb38   :  { %1658 = vmatprep.mubr.f32.mxu1 %v2530_v0  ;;  %1595 = vmatpush1.msra.mxu1 %v1592_v12  ;;  %v1666_v12 = vld [vmem:[%s3263_s15 + $0x8] sm:$0xff] }
 0xbf7   :  { %v1468_v8 = vpop.f32.mrf.mxu1 }
 0xbf8   :  { %2329 = vmatmul.mubr.msk.f32.vlgmr.msra.gmra.mxu0 %vm600_vm2, %v1468_v8  ;;  %v1668_v8 = vld [vmem:[%s3263_s15 + $0x18] sm:$0xff] }
 0xbf9   :  { %v2319_v9 = vpop.f32.mrf.mxu1  ;;  %1761 = vmatprep.mubr.f32.mxu0 %v2530_v0  ;;  %v1591_v0 = vld [vmem:[%s3262_s14 + $0xe8] sm:$0xff]  ;;  %1698 = vmatpush1.msra.mxu0 %v1695_v13  ;;  %v1562_v13 = vld [vmem:[%s3262_s14] sm:$0xff] }
 0xbfa   :  { %1596 = vmatprep.subr.mxu1 %v1591_v0  ;;  %1699 = vmatprep.subr.mxu0 %v1694_v14  ;;  %v1564_v9 = vld [vmem:[%s3262_s14 + $0x10] sm:$0xff]  ;;  %v1665_v0 = vld [vmem:[%s3263_s15] sm:$0xff] }
 0xbfb   :  { %1597 = vmatpush1.msra.mxu1 %v1590_v15  ;;  %1700 = vmatpush1.msra.mxu0 %v1693_v16 }
 0xbfc   :  { %1598 = vmatprep.subr.mxu1 %v1589_v17  ;;  %1701 = vmatprep.subr.mxu0 %v1692_v18  ;;  %v1937_v18 = vld [vmem:[%s3261_s13] ss:$0 sm:$0xff]  ;;  %s2535_s13 = smov [#allocation12]  }
 0xbfd   :  { %1599 = vmatpush1.msra.mxu1 %v1588_v19  ;;  %1702 = vmatpush1.msra.mxu0 %v1691_v20 }
 0xbfe   :  { %1600 = vmatprep.subr.mxu1 %v1587_v21  ;;  %1703 = vmatprep.subr.mxu0 %v1690_v22  ;;  %v1815_v21 = vld [vmem:[#allocation10 + $0xf8] sm:$0xff] }
 0xbff   :  { %1601 = vmatpush1.msra.mxu1 %v1586_v23  ;;  %1704 = vmatpush1.msra.mxu0 %v1689_v24  ;;  %v1799_v22 = vld [vmem:[#allocation10 + $0x78] sm:$0xff]  ;;  %v1814_v23 = vld [vmem:[#allocation10 + $0xf0] sm:$0xff] }
 0xc00   :  { %1602 = vmatprep.subr.mxu1 %v1585_v25  ;;  %1705 = vmatprep.subr.mxu0 %v1688_v27  ;;  %v1798_v24 = vld [vmem:[#allocation10 + $0x70] sm:$0xff]  ;;  %v1813_v25 = vld [vmem:[#allocation10 + $0xe8] sm:$0xff] }
 0xc01   :  { %1603 = vmatpush1.msra.mxu1 %v1584_v28  ;;  %1706 = vmatpush1.msra.mxu0 %v1687_v29  ;;  %v1797_v27 = vld [vmem:[#allocation10 + $0x68] sm:$0xff]  ;;  %v1812_v28 = vld [vmem:[#allocation10 + $0xe0] sm:$0xff] }
 0xc02   :  { %1604 = vmatprep.subr.mxu1 %v1583_v35  ;;  %1707 = vmatprep.subr.mxu0 %v1686_v36  ;;  %v1796_v29 = vld [vmem:[#allocation10 + $0x60] sm:$0xff]  ;;  %v1793_v35 = vld [vmem:[#allocation10 + $0x48] sm:$0xff] }
 0xc03   :  { %1708 = vmatpush1.msra.mxu0 %v1685_v37  ;;  %v1808_v36 = vld [vmem:[#allocation10 + $0xc0] sm:$0xff]  ;;  %v1807_v37 = vld [vmem:[#allocation10 + $0xb8] sm:$0xff] }
 0xc04   :  { %1709 = vmatprep.subr.mxu0 %v1684_v39  ;;  %v1806_v39 = vld [vmem:[#allocation10 + $0xb0] sm:$0xff] }
 0xc05   :  { %1710 = vmatpush1.msra.mxu0 %v1683_v42  ;;  %v1805_v42 = vld [vmem:[#allocation10 + $0xa8] sm:$0xff] }
 0xc06   :  { %1711 = vmatprep.subr.mxu0 %v1682_v26  ;;  %v1804_v26 = vld [vmem:[#allocation10 + $0xa0] sm:$0xff] }
 0xc07   :  { %1712 = vmatpush1.msra.mxu0 %v1681_v47  ;;  %v1803_v47 = vld [vmem:[#allocation10 + $0x98] sm:$0xff] }
 0xc08   :  { %1713 = vmatprep.subr.mxu0 %v1680_v41  ;;  %v1802_v41 = vld [vmem:[#allocation10 + $0x90] sm:$0xff] }
 0xc09   :  { %1714 = vmatpush1.msra.mxu0 %v1679_v50  ;;  %v1801_v50 = vld [vmem:[#allocation10 + $0x88] sm:$0xff] }
 0xc0a   :  { %1715 = vmatprep.subr.mxu0 %v1678_v52  ;;  %v1800_v52 = vld [vmem:[#allocation10 + $0x80] sm:$0xff] }
 0xc0b   :  { %1716 = vmatpush1.msra.mxu0 %v1677_v54 }
 0xc0c   :  { %1717 = vmatprep.subr.mxu0 %v1676_v56 }
 0xc0d   :  { %1718 = vmatpush1.msra.mxu0 %v1675_v58 }
 0xc0e   :  { %1719 = vmatprep.subr.mxu0 %v1674_v60 }
 0xc0f   :  { %1720 = vmatpush1.msra.mxu0 %v1673_v62 }
 0xc10   :  { %1721 = vmatprep.subr.mxu0 %v1672_v1 }
 0xc11   :  { %1722 = vmatpush1.msra.mxu0 %v1671_v43 }
 0xc12   :  { %1723 = vmatprep.subr.mxu0 %v1670_v3 }
 0xc13   :  { %1724 = vmatpush1.msra.mxu0 %v1669_v6 }
 0xc14   :  { %1725 = vmatprep.subr.mxu0 %v1668_v8 }
 0xc15   :  { %1726 = vmatpush1.msra.mxu0 %v1667_v10 }
 0xc16   :  { %1727 = vmatprep.subr.mxu0 %v1666_v12 }
 0xc17   :  { %1728 = vmatpush1.msra.mxu0 %v1665_v0 }
 0xcb8   :  { %v1541_v30 = vpop.f32.mrf.mxu0 }
 0xcb9   :  { %v1545_v31 = vadd.f32 %v1541_v30, %v1311_v2  ;;  %v1568_v2 = vld [vmem:[%s3262_s14 + $0x30] sm:$0xff]  ;;  %v1811_v30 = vld [vmem:[#allocation10 + $0xd8] sm:$0xff] }
 0xcba   :  { %v2330_v32 = vpop.f32.mrf.mxu0 }
 0xcbb   :  { %v3101_v33 = vadd.f32 %v1545_v31, %v2661_v4  ;;  %v1582_v4 = vld [vmem:[%s3262_s14 + $0xa0] sm:$0xff]  ;;  %v1795_v31 = vld [vmem:[#allocation10 + $0x58] sm:$0xff]  ;;  %s1904_s14 = sshll.u32 %s2535_s13, 4  ;;  %s1905_s14 = int_to_ptr.vmem [resolvable:$true] %s1904_s14 }
 0xcbc   :  { %1605 = vmatpush1.msra.mxu1 %v1582_v4  ;;  %v1810_v32 = vld [vmem:[#allocation10 + $0xd0] sm:$0xff]  ;;  %v1792_v4 = vld [vmem:[#allocation10 + $0x40] sm:$0xff]  ;;  %s2473_s15 = scalar_lea.vmem %s1905_s14, 128  ;;  %p2478_p12 = scmp.lt.s32.totalorder %s1905_s14, %s1905_s14 }
 0xcbd   :  { %1887 = vst [vmem:[#allocation12] sm:$0xff] %v3101_v33  ;;  %v1548_v34 = vmul.f32 %v3101_v33, %v3101_v33  ;;  %1606 = vmatprep.subr.mxu1 %v1581_v38  ;;  %v1791_v38 = vld [vmem:[#allocation10 + $0x38] sm:$0xff]  ;;  %p2474_p11 = scmp.ne.s32.totalorder %s1905_s14, %s2473_s15  ;;  %p2479_p13 = scmp.lt.s32.totalorder %s2473_s15, %s2473_s15 }
 0xcbe   :  { %1607 = vmatpush1.msra.mxu1 %v1580_v40  ;;  %v1790_v40 = vld [vmem:[#allocation10 + $0x30] sm:$0xff] }
 0xcbf   :  { %1549 = vadd.xlane.f32.xlu1 %v1548_v34  ;;  %1608 = vmatprep.subr.mxu1 %v1579_v45  ;;  %v1809_v34 = vld [vmem:[#allocation10 + $0xc8] sm:$0xff]  ;;  %p2480_p0 = por %p2479_p13, %p2478_p12 }
 0xcc0   :  { %1609 = vmatpush1.msra.mxu1 %v1578_v46  ;;  %v1789_v45 = vld [vmem:[#allocation10 + $0x28] sm:$0xff]  ;;  %v1788_v46 = vld [vmem:[#allocation10 + $0x20] sm:$0xff] }
 0xcc1   :  { %1610 = vmatprep.subr.mxu1 %v1577_v48  ;;  %v1787_v48 = vld [vmem:[#allocation10 + $0x18] sm:$0xff]  ;;  %p2481_p1 = pnand %p2480_p0, %p2474_p11 }
 0xcc2   :  { %1611 = vmatpush1.msra.mxu1 %v1576_v49  ;;  %v1786_v49 = vld [vmem:[#allocation10 + $0x10] sm:$0xff] }
 0xcc3   :  { %1612 = vmatprep.subr.mxu1 %v1575_v51  ;;  %v1785_v51 = vld [vmem:[#allocation10 + $0x8] sm:$0xff] }
 0xcc4   :  { %1613 = vmatpush1.msra.mxu1 %v1574_v53  ;;  %v1784_v53 = vld [vmem:[#allocation10] sm:$0xff] }
 0xcc5   :  { %1614 = vmatprep.subr.mxu1 %v1573_v55 }
 0xcc6   :  { %1615 = vmatpush1.msra.mxu1 %v1572_v57 }
 0xcc7   :  { %1616 = vmatprep.subr.mxu1 %v1571_v59 }
 0xcc8   :  { %1617 = vmatpush1.msra.mxu1 %v1570_v61 }
 0xcc9   :  { %1618 = vmatprep.subr.mxu1 %v1569_v63 }
 0xcca   :  { %1619 = vmatpush1.msra.mxu1 %v1568_v2 }
 0xccb   :  { %1620 = vmatprep.subr.mxu1 %v1567_v44 }
 0xccc   :  { %1621 = vmatpush1.msra.mxu1 %v1566_v5 }
 0xccd   :  { %1622 = vmatprep.subr.mxu1 %v1565_v7 }
 0xcce   :  { %1623 = vmatpush1.msra.mxu1 %v1564_v9 }
 0xccf   :  { %1624 = vmatprep.subr.mxu1 %v1563_v11 }
 0xcd0   :  { %1625 = vmatpush1.msra.mxu1 %v1562_v13 }
 0xcd1   :  { %2053 = vmatprep.subr.mxu1 %v1815_v21 }
 0xd48   :  { %v1550_v14 = vpop.xlane.xlu1 %1549 }
 0xd49   :  { %v1551_v15 = vmul.f32 0.0078125, %v1550_v14 }
 0xd4b   :  { %v1552_v16 = vadd.f32 1e-05, %v1551_v15 }
 0xd4d   :  { %2363 = vrsqrt.f32 %v1552_v16 }
 0xd5a   :  { %v2364_v17 = vpop.eup %2363 }
 0xd5b   :  { %v1554_v19 = vmul.f32 %v2364_v17, %v3101_v33  ;;  %v1794_v33 = vld [vmem:[#allocation10 + $0x50] sm:$0xff] }
 0xd5d   :  { %v1561_v20 = vmul.f32 %v1937_v18, %v1554_v19 }
 0xd5f   :  { %1659 = vmatmul.mubr.f32.vlgmr.msra.gmra.mxu1 %v1561_v20  ;;  %1762 = vmatmul.mubr.f32.vlgmr.msra.gmra.mxu0 %v1561_v20 }
 0xd60   :  { %2054 = vmatpush3.msra.mxu1 %v1799_v22 }
 0xd61   :  { %2055 = vmatprep.subr.mxu1 %v1814_v23 }
 0xd62   :  { %2056 = vmatpush3.msra.mxu1 %v1798_v24 }
 0xd63   :  { %2057 = vmatprep.subr.mxu1 %v1813_v25 }
 0xd64   :  { %2058 = vmatpush3.msra.mxu1 %v1797_v27 }
 0xd65   :  { %2059 = vmatprep.subr.mxu1 %v1812_v28 }
 0xd66   :  { %2060 = vmatpush3.msra.mxu1 %v1796_v29 }
 0xd67   :  { %2061 = vmatprep.subr.mxu1 %v1811_v30 }
 0xd68   :  { %2062 = vmatpush3.msra.mxu1 %v1795_v31 }
 0xd69   :  { %2063 = vmatprep.subr.mxu1 %v1810_v32 }
 0xd6a   :  { %2064 = vmatpush3.msra.mxu1 %v1794_v33 }
 0xd6b   :  { %2065 = vmatprep.subr.mxu1 %v1809_v34 }
 0xd6c   :  { %2066 = vmatpush3.msra.mxu1 %v1793_v35 }
 0xd6d   :  { %2067 = vmatprep.subr.mxu1 %v1808_v36 }
 0xd6e   :  { %2068 = vmatpush3.msra.mxu1 %v1792_v4 }
 0xd6f   :  { %2069 = vmatprep.subr.mxu1 %v1807_v37 }
 0xd70   :  { %2070 = vmatpush3.msra.mxu1 %v1791_v38 }
 0xd71   :  { %2071 = vmatprep.subr.mxu1 %v1806_v39 }
 0xd72   :  { %2072 = vmatpush3.msra.mxu1 %v1790_v40 }
 0xd73   :  { %2073 = vmatprep.subr.mxu1 %v1805_v42 }
 0xd74   :  { %2074 = vmatpush3.msra.mxu1 %v1789_v45 }
 0xd75   :  { %2075 = vmatprep.subr.mxu1 %v1804_v26 }
 0xd76   :  { %2076 = vmatpush3.msra.mxu1 %v1788_v46 }
 0xd77   :  { %2077 = vmatprep.subr.mxu1 %v1803_v47 }
 0xd78   :  { %2078 = vmatpush3.msra.mxu1 %v1787_v48 }
 0xd79   :  { %2079 = vmatprep.subr.mxu1 %v1802_v41 }
 0xd7a   :  { %2080 = vmatpush3.msra.mxu1 %v1786_v49 }
 0xd7b   :  { %2081 = vmatprep.subr.mxu1 %v1801_v50 }
 0xd7c   :  { %2082 = vmatpush3.msra.mxu1 %v1785_v51 }
 0xd7d   :  { %2083 = vmatprep.subr.mxu1 %v1800_v52 }
 0xd7e   :  { %2084 = vmatpush3.msra.mxu1 %v1784_v53 }
 0xe1f   :  { %v1660_v54 = vpop.f32.mrf.mxu1  ;;  %v1763_v63 = vpop.f32.mrf.mxu0 }
 0xe20   :  { %v1938_v55 = vmul.f32 -1.442695, %v1660_v54 }
 0xe21   :  { %v1662_v56 = vpop.f32.mrf.mxu1  ;;  %v1765_v44 = vpop.f32.mrf.mxu0 }
 0xe22   :  { %2365 = vpow2.f32 %v1938_v55  ;;  %v1939_v57 = vmul.f32 -1.442695, %v1662_v56 }
 0xe24   :  { %2367 = vpow2.f32 %v1939_v57 }
 0xe2f   :  { %v2366_v58 = vpop.eup %2365 }
 0xe30   :  { %v1774_v59 = vadd.f32 1.0, %v2366_v58 }
 0xe31   :  { %v2368_v60 = vpop.eup %2367 }
 0xe32   :  { %2369 = vrcp.f32 %v1774_v59  ;;  %v1775_v61 = vadd.f32 1.0, %v2368_v60 }
 0xe34   :  { %2371 = vrcp.f32 %v1775_v61 }
 0xe3f   :  { %v2370_v62 = vpop.eup %2369 }
 0xe40   :  { %v1780_v2 = vmul.f32 %v2370_v62, %v1660_v54 }
 0xe41   :  { %v2372_v1 = vpop.eup %2371 }
 0xe42   :  { %v1781_v43 = vmul.f32 %v2372_v1, %v1662_v56  ;;  %v1782_v5 = vmul.f32 %v1780_v2, %v1763_v63 }
 0xe44   :  { %v1783_v3 = vmul.f32 %v1781_v43, %v1765_v44 }
 0xe46   :  { %1880 = vmatprep.mubr.f32.mxu1 %v1783_v3 }
 0xe47   :  { %1881 = vmatmul.mubr.f32.vlgmr.msra.gmra.mxu1 %v1782_v5 }
 0xe48   :  { %2484 = shalt.err (!%p2481_p1)
}
 0xe49   :  { %1907 = dma.vmem_to_hbm [thread:$0]  %s1905_s14, 128, %s3266_s18, [#allocation13]  }
 0xe4a   :  { %s2536_s5 = smov [#allocation11]  }
 0xe4b   :  { %s1894_s0 = sshll.u32 %s2536_s5, 4  ;;  %s1895_s0 = int_to_ptr.vmem [resolvable:$true] %s1894_s0 }
 0xe4c   :  { %s2493_s19 = scalar_lea.vmem %s1895_s0, 128  ;;  %p2498_p3 = scmp.lt.s32.totalorder %s1895_s0, %s1895_s0 }
 0xe4d   :  { %p2494_p2 = scmp.ne.s32.totalorder %s1895_s0, %s2493_s19  ;;  %p2499_p4 = scmp.lt.s32.totalorder %s2493_s19, %s2493_s19 }
 0xe4f   :  { %p2500_p5 = por %p2499_p4, %p2498_p3 }
 0xe51   :  { %p2501_p6 = pnand %p2500_p5, %p2494_p2 }
 0xf07   :  { %v2085_v6 = vpop.f32.mrf.mxu1 }
 0xf09   :  { %v2086_v7 = vpop.f32.mrf.mxu1 }
 0xf0a   :  { %v2087_v8 = vadd.f32 %v2086_v7, %v2085_v6 }
 0xf0c   :  { %1886 = vst [vmem:[#allocation11] sm:$0xff] %v2087_v8 }
 0xf0d   :  { %2504 = shalt.err (!%p2501_p6)
}
 0xf0e   :  { %1897 = dma.vmem_to_hbm [thread:$0]  %s1895_s0, 128, %s3265_s17, [#allocation4]  }
 0xf0f   :  { %2519 = dma.done.wait [#allocation4], 128  }
 0xf10   :  { %2520 = vsyncadd [#allocation4], 4294967168 }
 0xf11   :  { %2521 = dma.done.wait [#allocation13], 128  }
 0xf12   :  { %2522 = vsyncadd [#allocation13], 4294967168 }
 0xf13   :  { %1914 = vsyncpa [#allocation3], 1 }
 0xf14   :  { %1915 = vsyncpa [#allocation6], 1 }
 0xf15   :  { %1916 = vsyncpa [#allocation9], 1 }
 0xf16   :  { %1917 = vsyncpa [#allocation4], 1 }
 0xf17   :  { %1918 = vsyncpa [#allocation13], 1 }

</bundles_post_ra>
